<compile_context>
chip_gen: v5e
topology: v5e:2x2
jax: 0.10.0
libtpu: 0.0.40
codegen_flags: <defaults>
</compile_context>

<pallas_src>
import functools
import math

import jax
import jax.numpy as jnp
from jax.experimental import pallas as pl
from jax.experimental.pallas import tpu as pltpu


# Set to True on TPU v7x (2 TensorCores/chip) to shard the two towers across
# TensorCores.  Plain "parallel" is the safe default (single-TC v5e/v6e).
USE_CORE_PARALLEL_TOWERS = False


def _tower_dimension_semantics():
    if USE_CORE_PARALLEL_TOWERS and hasattr(pltpu, "CORE_PARALLEL"):
        return (pltpu.CORE_PARALLEL, "arbitrary")
    return ("parallel", "arbitrary")


# ----------------------------------------------------------------------------
# Shared helper (works both inside Pallas kernels and in plain JAX)
# ----------------------------------------------------------------------------
def _layernorm(x, g, b, eps=1e-5):
    mu = jnp.mean(x, axis=-1, keepdims=True)
    var = jnp.mean((x - mu) ** 2, axis=-1, keepdims=True)
    return (x - mu) * jax.lax.rsqrt(var + eps) * g + b


# ----------------------------------------------------------------------------
# Fused tower kernel.
# grid = (tower, layer):  tower 0 = TCR, tower 1 = epitope ("parallel");
# the layer axis is "arbitrary" and streams one AttentionBlock's weights per
# step while the (B*L, D) activation lives in a VMEM scratch accumulator.
# ----------------------------------------------------------------------------
def tower_kernel(
    x_ref,       # (1, B, L, 1024) bf16  raw per-residue features, this tower
    pe_ref,      # (1, L, D)       f32   learned positional encoding (sliced)
    projw_ref,   # (1, 1024, D)    bf16
    projb_ref,   # (1, 1, D)       f32
    wq_ref,      # (1, H, D, dh)   bf16  this layer's Q weights (scale folded)
    bq_ref,      # (1, H, 1, dh)   f32
    wk_ref, bk_ref,                      # same shapes as wq / bq
    wv_ref, bv_ref,
    wo_ref,      # (1, H, dh, D)   bf16  out-proj, split by head rows
    bo_ref,      # (1, 1, 1, D)    f32
    g1_ref, be1_ref,                     # (1, 1, 1, D)  f32
    w1_ref,      # (1, 1, D, 4D)   bf16
    b1_ref,      # (1, 1, 1, 4D)   f32
    w2_ref,      # (1, 1, 4D, D)   bf16
    b2_ref,      # (1, 1, 1, D)    f32
    g2_ref, be2_ref,                     # (1, 1, 1, D)  f32
    pooled_ref,                          # out (1, B, D) f32
    x2_scr,                              # VMEM (B*L, D) f32  activations
    bias_scr,                            # VMEM (B, L)   f32  key-padding bias
    *, num_heads,
):
    layer = pl.program_id(1)
    num_layers = pl.num_programs(1)
    _, B, L, K = x_ref.shape
    D = projw_ref.shape[-1]
    H = num_heads
    dh = D // H
    bf16 = jnp.bfloat16
    f32 = jnp.float32

    # ---- first layer-step of each tower: embed + PE + padding mask ---------
    @pl.when(layer == 0)
    def _():
        x_raw = x_ref[0].reshape(B * L, K)                        # bf16
        # Padding mask computed in-kernel from data already resident in VMEM
        # (no wrapper-side HBM pass).  Row sum accumulated in f32 on the MXU
        # to mirror `tcr.sum(dim=-1) == 0`.
        row_sum = jnp.dot(x_raw, jnp.ones((K, 1), dtype=x_raw.dtype),
                          preferred_element_type=f32)             # (B*L, 1)
        bias_scr[...] = jnp.where(row_sum == 0.0, -1e9, 0.0).reshape(B, L)
        # 1024 -> D projection (bf16 weights, f32 accumulation), + positional
        # encoding.  This (and the reshape pair) happens once per tower, not
        # once per layer.
        emb = (jnp.dot(x_raw, projw_ref[0], preferred_element_type=f32)
               + projb_ref[0])                                    # (B*L, D)
        emb = emb.reshape(B, L, D) + pe_ref[0]
        x2_scr[...] = emb.reshape(B * L, D)

    # ---- one AttentionBlock per grid step (weights streamed per layer) ------
    x2 = x2_scr[...]                                              # (B*L, D) f32
    x2b = x2.astype(bf16)
    # Additive key-padding bias, broadcast once (hoisted out of the head loop).
    bias_b = jnp.broadcast_to(bias_scr[...][:, None, :], (B, L, L))

    attn = jnp.zeros((B * L, D), dtype=f32)
    # Static unroll over heads.  Per-head weight matrices (pre-split at init)
    # mean there is no sub-128-lane slicing of activations, no head concat and
    # no in-kernel transposes; per-head outputs are summed through per-head
    # out-projection matmuls.
    for h in range(H):
        q = (jnp.dot(x2b, wq_ref[0, h], preferred_element_type=f32)
             + bq_ref[0, h]).reshape(B, L, dh)        # 1/sqrt(dh) folded in Wq
        k = (jnp.dot(x2b, wk_ref[0, h], preferred_element_type=f32)
             + bk_ref[0, h]).reshape(B, L, dh)
        v = (jnp.dot(x2b, wv_ref[0, h], preferred_element_type=f32)
             + bv_ref[0, h]).reshape(B, L, dh)
        s = jnp.einsum('bqd,bkd->bqk', q.astype(bf16), k.astype(bf16),
                       preferred_element_type=f32) + bias_b       # (B, L, L)
        s = s - jnp.max(s, axis=-1, keepdims=True)
        p = jnp.exp(s)
        p = p * pl.reciprocal(jnp.sum(p, axis=-1, keepdims=True), approx=True)
        o = jnp.einsum('bqk,bkd->bqd', p.astype(bf16), v.astype(bf16),
                       preferred_element_type=f32)                # (B, L, dh)
        attn = attn + jnp.dot(o.reshape(B * L, dh).astype(bf16), wo_ref[0, h],
                              preferred_element_type=f32)
    attn = attn + bo_ref[0, 0]

    # residual + LayerNorm + FFN + residual + LayerNorm (all in f32)
    h1 = _layernorm(x2 + attn, g1_ref[0, 0], be1_ref[0, 0])
    ff = jnp.maximum(
        jnp.dot(h1.astype(bf16), w1_ref[0, 0], preferred_element_type=f32)
        + b1_ref[0, 0], 0.0)
    ff = (jnp.dot(ff.astype(bf16), w2_ref[0, 0], preferred_element_type=f32)
          + b2_ref[0, 0])
    x_out = _layernorm(h1 + ff, g2_ref[0, 0], be2_ref[0, 0])
    x2_scr[...] = x_out

    # ---- masked mean pool after the last layer ------------------------------
    @pl.when(layer == num_layers - 1)
    def _():
        keep = (bias_scr[...] == 0.0).astype(f32)[:, :, None]     # (B, L, 1)
        x3 = x_out.reshape(B, L, D)
        ssum = jnp.sum(x3 * keep, axis=1)                         # (B, D)
        cnt = jnp.maximum(jnp.sum(keep, axis=1), 1.0)             # (B, 1)
        pooled_ref[0] = ssum / cnt


def tower_forward(x_stack, pe_stack, p, cfg):
    T, B, L, K = x_stack.shape
    D = cfg["embed_dim"]
    NL = cfg["num_layers"]
    H = cfg["num_heads"]

    def tower_spec(arr):          # indexed by tower only; resident across layers
        n_rest = arr.ndim - 1

        def imap(t, l):
            return (t,) + (0,) * n_rest

        return pl.BlockSpec((1,) + tuple(arr.shape[1:]), imap)

    def layer_spec(arr):          # (2, NL, a, b): stream one layer per step
        a, b = int(arr.shape[2]), int(arr.shape[3])
        return pl.BlockSpec((1, 1, a, b), lambda t, l: (t, l, 0, 0))

    def head_spec(arr):           # (2, NL*H, a, b): all H heads of layer l
        a, b = int(arr.shape[2]), int(arr.shape[3])
        return pl.BlockSpec((1, H, a, b), lambda t, l: (t, l, 0, 0))

    operands = (x_stack, pe_stack, p["proj_w"], p["proj_b"],
                p["wq"], p["bq"], p["wk"], p["bk"], p["wv"], p["bv"],
                p["wo"], p["bo"], p["ln1_g"], p["ln1_b"],
                p["w1"], p["b1"], p["w2"], p["b2"], p["ln2_g"], p["ln2_b"])

    in_specs = [tower_spec(x_stack), tower_spec(pe_stack),
                tower_spec(p["proj_w"]), tower_spec(p["proj_b"]),
                head_spec(p["wq"]), head_spec(p["bq"]),
                head_spec(p["wk"]), head_spec(p["bk"]),
                head_spec(p["wv"]), head_spec(p["bv"]),
                head_spec(p["wo"]), layer_spec(p["bo"]),
                layer_spec(p["ln1_g"]), layer_spec(p["ln1_b"]),
                layer_spec(p["w1"]), layer_spec(p["b1"]),
                layer_spec(p["w2"]), layer_spec(p["b2"]),
                layer_spec(p["ln2_g"]), layer_spec(p["ln2_b"])]

    kernel = functools.partial(tower_kernel, num_heads=H)

    # NOTE: at production scale (large B*L), the 1024-d feature slab should be
    # streamed in L-tiles instead of kept resident for all layer steps.
    return pl.pallas_call(
        kernel,
        out_shape=jax.ShapeDtypeStruct((T, B, D), jnp.float32),
        grid=(T, NL),
        in_specs=in_specs,
        out_specs=pl.BlockSpec((1, B, D), lambda t, l: (t, 0, 0)),
        scratch_shapes=[pltpu.VMEM((B * L, D), jnp.float32),
                        pltpu.VMEM((B, L), jnp.float32)],
        compiler_params=pltpu.CompilerParams(
            dimension_semantics=_tower_dimension_semantics()),
    )(*operands)


# ----------------------------------------------------------------------------
# Plain-JAX glue (tiny; fused by XLA): periodic embeddings, categorical
# gathers, concat and the classifier head.  The classifier (~0.1 MB of work)
# is deliberately NOT a pallas_call (per perf review): keeping it in XLA lets
# it fuse with the surrounding glue and drops a kernel dispatch.
# ----------------------------------------------------------------------------
def periodic_embedding(x):
    d = x.shape[-1]
    div_term = jnp.exp(jnp.arange(d, dtype=x.dtype) * (-(math.log(10000.0) / d)))
    return jnp.concatenate([jnp.sin(x * div_term), jnp.cos(x * div_term)], axis=-1)


def classifier_forward(p, x):
    h = jnp.maximum(_layernorm(x @ p["w0"] + p["b0"], p["ln0_g"], p["ln0_b"]), 0.0)
    # ResidualBlock: x + Lin(ReLU(LN(Lin(ReLU(LN(x))))))
    r = jnp.maximum(_layernorm(h, p["rln1_g"], p["rln1_b"]), 0.0) @ p["rw1"] + p["rb1"]
    r = jnp.maximum(_layernorm(r, p["rln2_g"], p["rln2_b"]), 0.0) @ p["rw2"] + p["rb2"]
    h = h + r
    return h @ p["wout"] + p["bout"]


def forward(params, tcr, epitope, tcr_physchem, epi_physchem, trbv, trbj, mhc, cfg):
    B, Lt, _ = tcr.shape
    Le = epitope.shape[1]
    L = max(Lt, Le)

    def pad_seq(x):
        if x.shape[1] == L:
            return x
        return jnp.pad(x, ((0, 0), (0, L - x.shape[1]), (0, 0)))

    # bf16 at the boundary: halves HBM->VMEM bytes of the dominant input; the
    # exactly-zero padding rows stay exactly zero, so the in-kernel padding
    # mask is unaffected.  (XLA fuses cast + pad + stack into one pass.)
    x_stack = jnp.stack([pad_seq(tcr).astype(jnp.bfloat16),
                         pad_seq(epitope).astype(jnp.bfloat16)], axis=0)

    def pe_slice(pe, Lx):
        pe = pe[0, :Lx, :]
        if Lx != L:
            pe = jnp.pad(pe, ((0, L - Lx), (0, 0)))
        return pe

    pe_stack = jnp.stack([pe_slice(params["tcr_pe"], Lt),
                          pe_slice(params["epi_pe"], Le)], axis=0)   # (2, L, D)

    pooled = tower_forward(x_stack, pe_stack, params, cfg)           # (2, B, D)
    tcr_pooled, epi_pooled = pooled[0], pooled[1]

    trbv_emb = params["trbv_table"][trbv[:, 0]]
    trbj_emb = params["trbj_table"][trbj[:, 0]]
    mhc_emb = params["mhc_table"][mhc[:, 0]]
    tcr_phys = periodic_embedding(tcr_physchem)
    epi_phys = periodic_embedding(epi_physchem)

    final_vector = jnp.concatenate(
        [tcr_pooled, epi_pooled, trbv_emb, trbj_emb, mhc_emb, tcr_phys, epi_phys],
        axis=1)

    return classifier_forward(params["classifier"], final_vector)[:, 0]


# ----------------------------------------------------------------------------
# Deterministic parameter initialization (synthetic; not a checkpoint load).
# Matmul weights are stored in bf16, pre-split per head, with the attention
# scale folded into Wq (a checkpoint loader would also fold it into bq).
# Leading axis 0 = TCR tower, 1 = epitope tower.
# ----------------------------------------------------------------------------
def init_params(key, cfg):
    D = cfg["embed_dim"]
    F = 4 * D
    NL = cfg["num_layers"]
    H = cfg["num_heads"]
    dh = D // H
    Hd = cfg["classifier_hidden_dim"]
    Pd = cfg["physchem_dim"]
    cls_in = D * 5 + (Pd * 2) * 2
    attn_scale = 1.0 / math.sqrt(dh)
    bf16 = jnp.bfloat16

    keys = iter(jax.random.split(key, 64))

    def nrm(shape, scale=0.05, dtype=jnp.float32):
        return (scale * jax.random.normal(next(keys), shape)).astype(dtype)

    zeros = lambda s: jnp.zeros(s, jnp.float32)
    ones = lambda s: jnp.ones(s, jnp.float32)

    return dict(
        # 1024 -> D projections (both towers stacked), bf16
        proj_w=nrm((2, 1024, D), dtype=bf16), proj_b=zeros((2, 1, D)),
        # per-head attention weights stacked as (tower, layer*head, ...), bf16;
        # 1/sqrt(dh) folded into Wq (bq is zero here, else it would be folded too)
        wq=(nrm((2, NL * H, D, dh)) * attn_scale).astype(bf16),
        bq=zeros((2, NL * H, 1, dh)),
        wk=nrm((2, NL * H, D, dh), dtype=bf16), bk=zeros((2, NL * H, 1, dh)),
        wv=nrm((2, NL * H, D, dh), dtype=bf16), bv=zeros((2, NL * H, 1, dh)),
        wo=nrm((2, NL * H, dh, D), dtype=bf16), bo=zeros((2, NL, 1, D)),
        ln1_g=ones((2, NL, 1, D)), ln1_b=zeros((2, NL, 1, D)),
        w1=nrm((2, NL, D, F), dtype=bf16), b1=zeros((2, NL, 1, F)),
        w2=nrm((2, NL, F, D), dtype=bf16), b2=zeros((2, NL, 1, D)),
        ln2_g=ones((2, NL, 1, D)), ln2_b=zeros((2, NL, 1, D)),
        # positional encodings (max lengths may differ between towers)
        tcr_pe=nrm((1, cfg["max_tcr_length"], D), scale=1.0),
        epi_pe=nrm((1, cfg["max_epitope_length"], D), scale=1.0),
        # padding_idx row zeroed, matching nn.Embedding(padding_idx=vocab-1)
        trbv_table=nrm((cfg["trbv_vocab_size"], D)).at[cfg["trbv_vocab_size"] - 1].set(0.0),
        trbj_table=nrm((cfg["trbj_vocab_size"], D)).at[cfg["trbj_vocab_size"] - 1].set(0.0),
        mhc_table=nrm((cfg["mhc_vocab_size"], D)).at[cfg["mhc_vocab_size"] - 1].set(0.0),
        classifier=dict(
            w0=nrm((cls_in, Hd)), b0=zeros((1, Hd)),
            ln0_g=ones((1, Hd)), ln0_b=zeros((1, Hd)),
            rln1_g=ones((1, Hd)), rln1_b=zeros((1, Hd)),
            rw1=nrm((Hd, Hd)), rb1=zeros((1, Hd)),
            rln2_g=ones((1, Hd)), rln2_b=zeros((1, Hd)),
            rw2=nrm((Hd, Hd)), rb2=zeros((1, Hd)),
            wout=nrm((Hd, 1)), bout=zeros((1, 1)),
        ),
    )


# ----------------------------------------------------------------------------
if __name__ == "__main__":
    cfg = dict(
        embed_dim=32, num_heads=4, num_layers=2,
        max_tcr_length=8, max_epitope_length=8,
        classifier_hidden_dim=64, physchem_dim=10,
        trbv_vocab_size=50, trbj_vocab_size=20, mhc_vocab_size=100,
    )
    B, L = 2, 8

    key = jax.random.PRNGKey(0)
    kparam, kdata = jax.random.split(key)
    params = init_params(kparam, cfg)

    dkeys = jax.random.split(kdata, 7)
    tcr = jax.random.normal(dkeys[0], (B, L, 1024), jnp.float32)
    epitope = jax.random.normal(dkeys[1], (B, L, 1024), jnp.float32)
    # zero trailing positions to exercise the padding-mask path
    tcr = tcr.at[:, 6:, :].set(0.0)
    epitope = epitope.at[:, 5:, :].set(0.0)
    tcr_physchem = jax.random.normal(dkeys[2], (B, cfg["physchem_dim"]), jnp.float32)
    epi_physchem = jax.random.normal(dkeys[3], (B, cfg["physchem_dim"]), jnp.float32)
    trbv = jax.random.randint(dkeys[4], (B, 1), 0, cfg["trbv_vocab_size"] - 1, jnp.int32)
    trbj = jax.random.randint(dkeys[5], (B, 1), 0, cfg["trbj_vocab_size"] - 1, jnp.int32)
    mhc = jax.random.randint(dkeys[6], (B, 1), 0, cfg["mhc_vocab_size"] - 1, jnp.int32)

    fwd = jax.jit(lambda p, a, b, c, d, e, f, g: forward(p, a, b, c, d, e, f, g, cfg))
    out = fwd(params, tcr, epitope, tcr_physchem, epi_physchem, trbv, trbj, mhc)
    jax.block_until_ready(out)
    assert out.shape == (B,) and out.dtype == jnp.float32
    assert bool(jnp.all(jnp.isfinite(out)))
    print("KERNEL_OK")
</pallas_src>

<mosaic_0001>
module attributes {stable_mosaic.version = 11 : i64} {
  func.func @tower_kernel(%arg0: i32, %arg1: i32, %arg2: memref<1x2x8x1024xbf16, #tpu.memory_space<vmem>>, %arg3: memref<1x8x32xf32, #tpu.memory_space<vmem>>, %arg4: memref<1x1024x32xbf16, #tpu.memory_space<vmem>>, %arg5: memref<1x1x32xf32, #tpu.memory_space<vmem>>, %arg6: memref<1x4x32x8xbf16, #tpu.memory_space<vmem>>, %arg7: memref<1x4x1x8xf32, #tpu.memory_space<vmem>>, %arg8: memref<1x4x32x8xbf16, #tpu.memory_space<vmem>>, %arg9: memref<1x4x1x8xf32, #tpu.memory_space<vmem>>, %arg10: memref<1x4x32x8xbf16, #tpu.memory_space<vmem>>, %arg11: memref<1x4x1x8xf32, #tpu.memory_space<vmem>>, %arg12: memref<1x4x8x32xbf16, #tpu.memory_space<vmem>>, %arg13: memref<1x1x1x32xf32, #tpu.memory_space<vmem>>, %arg14: memref<1x1x1x32xf32, #tpu.memory_space<vmem>>, %arg15: memref<1x1x1x32xf32, #tpu.memory_space<vmem>>, %arg16: memref<1x1x32x128xbf16, #tpu.memory_space<vmem>>, %arg17: memref<1x1x1x128xf32, #tpu.memory_space<vmem>>, %arg18: memref<1x1x128x32xbf16, #tpu.memory_space<vmem>>, %arg19: memref<1x1x1x32xf32, #tpu.memory_space<vmem>>, %arg20: memref<1x1x1x32xf32, #tpu.memory_space<vmem>>, %arg21: memref<1x1x1x32xf32, #tpu.memory_space<vmem>>, %arg22: memref<1x2x32xf32, #tpu.memory_space<vmem>>, %arg23: memref<16x32xf32, #tpu.memory_space<vmem>>, %arg24: memref<2x8xf32, #tpu.memory_space<vmem>>) attributes {dimension_semantics = [#tpu.dimension_semantics<parallel>, #tpu.dimension_semantics<arbitrary>], iteration_bounds = array<i64: 2, 2>, scalar_prefetch = 0 : i64, scratch_operands = 2 : i64, tpu.core_type = #tpu.core_type<tc>, window_params = [{transform_indices = @transform_0, window_bounds = array<i64: 1, 2, 8, 1024>}, {transform_indices = @transform_1, window_bounds = array<i64: 1, 8, 32>}, {transform_indices = @transform_2, window_bounds = array<i64: 1, 1024, 32>}, {transform_indices = @transform_3, window_bounds = array<i64: 1, 1, 32>}, {transform_indices = @transform_4, window_bounds = array<i64: 1, 4, 32, 8>}, {transform_indices = @transform_5, window_bounds = array<i64: 1, 4, 1, 8>}, {transform_indices = @transform_6, window_bounds = array<i64: 1, 4, 32, 8>}, {transform_indices = @transform_7, window_bounds = array<i64: 1, 4, 1, 8>}, {transform_indices = @transform_8, window_bounds = array<i64: 1, 4, 32, 8>}, {transform_indices = @transform_9, window_bounds = array<i64: 1, 4, 1, 8>}, {transform_indices = @transform_10, window_bounds = array<i64: 1, 4, 8, 32>}, {transform_indices = @transform_11, window_bounds = array<i64: 1, 1, 1, 32>}, {transform_indices = @transform_12, window_bounds = array<i64: 1, 1, 1, 32>}, {transform_indices = @transform_13, window_bounds = array<i64: 1, 1, 1, 32>}, {transform_indices = @transform_14, window_bounds = array<i64: 1, 1, 32, 128>}, {transform_indices = @transform_15, window_bounds = array<i64: 1, 1, 1, 128>}, {transform_indices = @transform_16, window_bounds = array<i64: 1, 1, 128, 32>}, {transform_indices = @transform_17, window_bounds = array<i64: 1, 1, 1, 32>}, {transform_indices = @transform_18, window_bounds = array<i64: 1, 1, 1, 32>}, {transform_indices = @transform_19, window_bounds = array<i64: 1, 1, 1, 32>}, {transform_indices = @transform_20, window_bounds = array<i64: 1, 2, 32>}]} {
    %c0_i32 = arith.constant 0 : i32
    %0 = arith.cmpi eq, %arg1, %c0_i32 : i32
    %1 = arith.extui %0 : i1 to i32
    %c0_i32_0 = arith.constant 0 : i32
    %2 = arith.cmpi ne, %1, %c0_i32_0 : i32
    scf.if %2 {
      %c0_197 = arith.constant 0 : index
      %c0_198 = arith.constant 0 : index
      %c0_199 = arith.constant 0 : index
      %c0_200 = arith.constant 0 : index
      %278 = vector.load %arg2[%c0_197, %c0_198, %c0_199, %c0_200] : memref<1x2x8x1024xbf16, #tpu.memory_space<vmem>>, vector<1x2x8x1024xbf16>
      %279 = vector.shape_cast %278 : vector<1x2x8x1024xbf16> to vector<2x8x1024xbf16>
      %280 = vector.shape_cast %279 : vector<2x8x1024xbf16> to vector<16x1024xbf16>
      %cst_201 = arith.constant 1.000000e+00 : bf16
      %281 = vector.broadcast %cst_201 : bf16 to vector<1024x1xbf16>
      %cst_202 = arith.constant dense<0.000000e+00> : vector<16x1xf32>
      %282 = tpu.matmul %280, %281, %cst_202 {dimension_numbers = #tpu.dot_dimension_numbers<[1], [0], [0], [1], [0, 0, 1, 1], [], []>} : vector<16x1024xbf16>, vector<1024x1xbf16>, vector<16x1xf32> -> vector<16x1xf32>
      %cst_203 = arith.constant 0.000000e+00 : f32
      %283 = vector.broadcast %cst_203 : f32 to vector<16x1xf32>
      %284 = arith.cmpf oeq, %282, %283 : vector<16x1xf32>
      %cst_204 = arith.constant -1.000000e+09 : f32
      %cst_205 = arith.constant 0.000000e+00 : f32
      %285 = vector.broadcast %cst_204 : f32 to vector<16x1xf32>
      %286 = vector.broadcast %cst_205 : f32 to vector<16x1xf32>
      %287 = arith.select %284, %285, %286 : vector<16x1xi1>, vector<16x1xf32>
      %288 = vector.shape_cast %287 : vector<16x1xf32> to vector<2x8xf32>
      %c0_206 = arith.constant 0 : index
      %c0_207 = arith.constant 0 : index
      %289 = vector.load %arg24[%c0_206, %c0_207] : memref<2x8xf32, #tpu.memory_space<vmem>>, vector<2x8xf32>
      tpu.vector_store %arg24[%c0_206, %c0_207], %288 {strides = array<i32>} : memref<2x8xf32, #tpu.memory_space<vmem>>, vector<2x8xf32>,
      %c0_208 = arith.constant 0 : index
      %c0_209 = arith.constant 0 : index
      %c0_210 = arith.constant 0 : index
      %290 = vector.load %arg4[%c0_208, %c0_209, %c0_210] : memref<1x1024x32xbf16, #tpu.memory_space<vmem>>, vector<1x1024x32xbf16>
      %291 = vector.shape_cast %290 : vector<1x1024x32xbf16> to vector<1024x32xbf16>
      %cst_211 = arith.constant dense<0.000000e+00> : vector<16x32xf32>
      %292 = tpu.matmul %280, %291, %cst_211 {dimension_numbers = #tpu.dot_dimension_numbers<[1], [0], [0], [1], [0, 0, 1, 1], [], []>} : vector<16x1024xbf16>, vector<1024x32xbf16>, vector<16x32xf32> -> vector<16x32xf32>
      %c0_212 = arith.constant 0 : index
      %c0_213 = arith.constant 0 : index
      %c0_214 = arith.constant 0 : index
      %293 = vector.load %arg5[%c0_212, %c0_213, %c0_214] : memref<1x1x32xf32, #tpu.memory_space<vmem>>, vector<1x1x32xf32>
      %294 = vector.shape_cast %293 : vector<1x1x32xf32> to vector<1x32xf32>
      %295 = vector.broadcast %294 : vector<1x32xf32> to vector<16x32xf32>
      %296 = arith.addf %292, %295 : vector<16x32xf32>
      %297 = vector.shape_cast %296 : vector<16x32xf32> to vector<2x8x32xf32>
      %c0_215 = arith.constant 0 : index
      %c0_216 = arith.constant 0 : index
      %c0_217 = arith.constant 0 : index
      %298 = vector.load %arg3[%c0_215, %c0_216, %c0_217] : memref<1x8x32xf32, #tpu.memory_space<vmem>>, vector<1x8x32xf32>
      %299 = vector.shape_cast %298 : vector<1x8x32xf32> to vector<8x32xf32>
      %300 = vector.shape_cast %299 : vector<8x32xf32> to vector<1x8x32xf32>
      %301 = vector.broadcast %300 : vector<1x8x32xf32> to vector<2x8x32xf32>
      %302 = arith.addf %297, %301 : vector<2x8x32xf32>
      %303 = vector.shape_cast %302 : vector<2x8x32xf32> to vector<16x32xf32>
      %c0_218 = arith.constant 0 : index
      %c0_219 = arith.constant 0 : index
      %304 = vector.load %arg23[%c0_218, %c0_219] : memref<16x32xf32, #tpu.memory_space<vmem>>, vector<16x32xf32>
      tpu.vector_store %arg23[%c0_218, %c0_219], %303 {strides = array<i32>} : memref<16x32xf32, #tpu.memory_space<vmem>>, vector<16x32xf32>,
    } else {
    }
    %c0 = arith.constant 0 : index
    %c0_1 = arith.constant 0 : index
    %3 = vector.load %arg23[%c0, %c0_1] : memref<16x32xf32, #tpu.memory_space<vmem>>, vector<16x32xf32>
    %4 = arith.truncf %3 : vector<16x32xf32> to vector<16x32xbf16>
    %c0_2 = arith.constant 0 : index
    %c0_3 = arith.constant 0 : index
    %5 = vector.load %arg24[%c0_2, %c0_3] : memref<2x8xf32, #tpu.memory_space<vmem>>, vector<2x8xf32>
    %6 = vector.shape_cast %5 : vector<2x8xf32> to vector<2x1x8xf32>
    %7 = vector.shape_cast %6 : vector<2x1x8xf32> to vector<2x1x8xf32>
    %8 = vector.broadcast %7 : vector<2x1x8xf32> to vector<2x8x8xf32>
    %cst = arith.constant 0.000000e+00 : f32
    %9 = vector.broadcast %cst : f32 to vector<16x32xf32>
    %c0_4 = arith.constant 0 : index
    %c0_5 = arith.constant 0 : index
    %c0_6 = arith.constant 0 : index
    %c0_7 = arith.constant 0 : index
    %10 = vector.load %arg6[%c0_4, %c0_5, %c0_6, %c0_7] : memref<1x4x32x8xbf16, #tpu.memory_space<vmem>>, vector<1x1x32x8xbf16>
    %11 = vector.shape_cast %10 : vector<1x1x32x8xbf16> to vector<32x8xbf16>
    %cst_8 = arith.constant dense<0.000000e+00> : vector<16x8xf32>
    %12 = tpu.matmul %4, %11, %cst_8 {dimension_numbers = #tpu.dot_dimension_numbers<[1], [0], [0], [1], [0, 0, 1, 1], [], []>} : vector<16x32xbf16>, vector<32x8xbf16>, vector<16x8xf32> -> vector<16x8xf32>
    %c0_9 = arith.constant 0 : index
    %c0_10 = arith.constant 0 : index
    %c0_11 = arith.constant 0 : index
    %c0_12 = arith.constant 0 : index
    %13 = vector.load %arg7[%c0_9, %c0_10, %c0_11, %c0_12] : memref<1x4x1x8xf32, #tpu.memory_space<vmem>>, vector<1x1x1x8xf32>
    %14 = vector.shape_cast %13 : vector<1x1x1x8xf32> to vector<1x8xf32>
    %15 = vector.broadcast %14 : vector<1x8xf32> to vector<16x8xf32>
    %16 = arith.addf %12, %15 : vector<16x8xf32>
    %17 = vector.shape_cast %16 : vector<16x8xf32> to vector<2x8x8xf32>
    %c0_13 = arith.constant 0 : index
    %c0_14 = arith.constant 0 : index
    %c0_15 = arith.constant 0 : index
    %c0_16 = arith.constant 0 : index
    %18 = vector.load %arg8[%c0_13, %c0_14, %c0_15, %c0_16] : memref<1x4x32x8xbf16, #tpu.memory_space<vmem>>, vector<1x1x32x8xbf16>
    %19 = vector.shape_cast %18 : vector<1x1x32x8xbf16> to vector<32x8xbf16>
    %cst_17 = arith.constant dense<0.000000e+00> : vector<16x8xf32>
    %20 = tpu.matmul %4, %19, %cst_17 {dimension_numbers = #tpu.dot_dimension_numbers<[1], [0], [0], [1], [0, 0, 1, 1], [], []>} : vector<16x32xbf16>, vector<32x8xbf16>, vector<16x8xf32> -> vector<16x8xf32>
    %c0_18 = arith.constant 0 : index
    %c0_19 = arith.constant 0 : index
    %c0_20 = arith.constant 0 : index
    %c0_21 = arith.constant 0 : index
    %21 = vector.load %arg9[%c0_18, %c0_19, %c0_20, %c0_21] : memref<1x4x1x8xf32, #tpu.memory_space<vmem>>, vector<1x1x1x8xf32>
    %22 = vector.shape_cast %21 : vector<1x1x1x8xf32> to vector<1x8xf32>
    %23 = vector.broadcast %22 : vector<1x8xf32> to vector<16x8xf32>
    %24 = arith.addf %20, %23 : vector<16x8xf32>
    %25 = vector.shape_cast %24 : vector<16x8xf32> to vector<2x8x8xf32>
    %c0_22 = arith.constant 0 : index
    %c0_23 = arith.constant 0 : index
    %c0_24 = arith.constant 0 : index
    %c0_25 = arith.constant 0 : index
    %26 = vector.load %arg10[%c0_22, %c0_23, %c0_24, %c0_25] : memref<1x4x32x8xbf16, #tpu.memory_space<vmem>>, vector<1x1x32x8xbf16>
    %27 = vector.shape_cast %26 : vector<1x1x32x8xbf16> to vector<32x8xbf16>
    %cst_26 = arith.constant dense<0.000000e+00> : vector<16x8xf32>
    %28 = tpu.matmul %4, %27, %cst_26 {dimension_numbers = #tpu.dot_dimension_numbers<[1], [0], [0], [1], [0, 0, 1, 1], [], []>} : vector<16x32xbf16>, vector<32x8xbf16>, vector<16x8xf32> -> vector<16x8xf32>
    %c0_27 = arith.constant 0 : index
    %c0_28 = arith.constant 0 : index
    %c0_29 = arith.constant 0 : index
    %c0_30 = arith.constant 0 : index
    %29 = vector.load %arg11[%c0_27, %c0_28, %c0_29, %c0_30] : memref<1x4x1x8xf32, #tpu.memory_space<vmem>>, vector<1x1x1x8xf32>
    %30 = vector.shape_cast %29 : vector<1x1x1x8xf32> to vector<1x8xf32>
    %31 = vector.broadcast %30 : vector<1x8xf32> to vector<16x8xf32>
    %32 = arith.addf %28, %31 : vector<16x8xf32>
    %33 = vector.shape_cast %32 : vector<16x8xf32> to vector<2x8x8xf32>
    %34 = arith.truncf %17 : vector<2x8x8xf32> to vector<2x8x8xbf16>
    %35 = arith.truncf %25 : vector<2x8x8xf32> to vector<2x8x8xbf16>
    "tpu.trace_start"() <{level = 10 : i32, message = "bqd,bkd->bqk"}> : () -> ()
    %cst_31 = arith.constant dense<0.000000e+00> : vector<2x8x8xf32>
    %36 = tpu.matmul %34, %35, %cst_31 {dimension_numbers = #tpu.dot_dimension_numbers<[2], [2], [1], [1], [0, 0, 0, 1, 1, 1], [0], [0]>} : vector<2x8x8xbf16>, vector<2x8x8xbf16>, vector<2x8x8xf32> -> vector<2x8x8xf32>
    "tpu.trace_stop"() : () -> ()
    %37 = arith.addf %36, %8 : vector<2x8x8xf32>
    %cst_32 = arith.constant dense<0xFF800000> : vector<2x8xf32>
    %38 = vector.multi_reduction <maximumf>, %37, %cst_32 [2] : vector<2x8x8xf32> to vector<2x8xf32>
    %39 = vector.shape_cast %38 : vector<2x8xf32> to vector<2x8x1xf32>
    %40 = vector.broadcast %39 : vector<2x8x1xf32> to vector<2x8x8xf32>
    %41 = arith.subf %37, %40 : vector<2x8x8xf32>
    %42 = math.exp %41 : vector<2x8x8xf32>
    %cst_33 = arith.constant dense<0.000000e+00> : vector<2x8xf32>
    %43 = vector.multi_reduction <add>, %42, %cst_33 [2] : vector<2x8x8xf32> to vector<2x8xf32>
    %44 = vector.shape_cast %43 : vector<2x8xf32> to vector<2x8x1xf32>
    %45 = tpu.reciprocal %44 {approx = true} : vector<2x8x1xf32> -> vector<2x8x1xf32>
    %46 = vector.broadcast %45 : vector<2x8x1xf32> to vector<2x8x8xf32>
    %47 = arith.mulf %42, %46 : vector<2x8x8xf32>
    %48 = arith.truncf %47 : vector<2x8x8xf32> to vector<2x8x8xbf16>
    %49 = arith.truncf %33 : vector<2x8x8xf32> to vector<2x8x8xbf16>
    "tpu.trace_start"() <{level = 10 : i32, message = "bqk,bkd->bqd"}> : () -> ()
    %cst_34 = arith.constant dense<0.000000e+00> : vector<2x8x8xf32>
    %50 = tpu.matmul %48, %49, %cst_34 {dimension_numbers = #tpu.dot_dimension_numbers<[2], [1], [1], [2], [0, 0, 0, 1, 1, 2], [0], [0]>} : vector<2x8x8xbf16>, vector<2x8x8xbf16>, vector<2x8x8xf32> -> vector<2x8x8xf32>
    "tpu.trace_stop"() : () -> ()
    %51 = vector.shape_cast %50 : vector<2x8x8xf32> to vector<16x8xf32>
    %52 = arith.truncf %51 : vector<16x8xf32> to vector<16x8xbf16>
    %c0_35 = arith.constant 0 : index
    %c0_36 = arith.constant 0 : index
    %c0_37 = arith.constant 0 : index
    %c0_38 = arith.constant 0 : index
    %53 = vector.load %arg12[%c0_35, %c0_36, %c0_37, %c0_38] : memref<1x4x8x32xbf16, #tpu.memory_space<vmem>>, vector<1x1x8x32xbf16>
    %54 = vector.shape_cast %53 : vector<1x1x8x32xbf16> to vector<8x32xbf16>
    %cst_39 = arith.constant dense<0.000000e+00> : vector<16x32xf32>
    %55 = tpu.matmul %52, %54, %cst_39 {dimension_numbers = #tpu.dot_dimension_numbers<[1], [0], [0], [1], [0, 0, 1, 1], [], []>} : vector<16x8xbf16>, vector<8x32xbf16>, vector<16x32xf32> -> vector<16x32xf32>
    %56 = arith.addf %9, %55 : vector<16x32xf32>
    %c0_40 = arith.constant 0 : index
    %c1 = arith.constant 1 : index
    %c0_41 = arith.constant 0 : index
    %c0_42 = arith.constant 0 : index
    %57 = vector.load %arg6[%c0_40, %c1, %c0_41, %c0_42] : memref<1x4x32x8xbf16, #tpu.memory_space<vmem>>, vector<1x1x32x8xbf16>
    %58 = vector.shape_cast %57 : vector<1x1x32x8xbf16> to vector<32x8xbf16>
    %cst_43 = arith.constant dense<0.000000e+00> : vector<16x8xf32>
    %59 = tpu.matmul %4, %58, %cst_43 {dimension_numbers = #tpu.dot_dimension_numbers<[1], [0], [0], [1], [0, 0, 1, 1], [], []>} : vector<16x32xbf16>, vector<32x8xbf16>, vector<16x8xf32> -> vector<16x8xf32>
    %c0_44 = arith.constant 0 : index
    %c1_45 = arith.constant 1 : index
    %c0_46 = arith.constant 0 : index
    %c0_47 = arith.constant 0 : index
    %60 = vector.load %arg7[%c0_44, %c1_45, %c0_46, %c0_47] : memref<1x4x1x8xf32, #tpu.memory_space<vmem>>, vector<1x1x1x8xf32>
    %61 = vector.shape_cast %60 : vector<1x1x1x8xf32> to vector<1x8xf32>
    %62 = vector.broadcast %61 : vector<1x8xf32> to vector<16x8xf32>
    %63 = arith.addf %59, %62 : vector<16x8xf32>
    %64 = vector.shape_cast %63 : vector<16x8xf32> to vector<2x8x8xf32>
    %c0_48 = arith.constant 0 : index
    %c1_49 = arith.constant 1 : index
    %c0_50 = arith.constant 0 : index
    %c0_51 = arith.constant 0 : index
    %65 = vector.load %arg8[%c0_48, %c1_49, %c0_50, %c0_51] : memref<1x4x32x8xbf16, #tpu.memory_space<vmem>>, vector<1x1x32x8xbf16>
    %66 = vector.shape_cast %65 : vector<1x1x32x8xbf16> to vector<32x8xbf16>
    %cst_52 = arith.constant dense<0.000000e+00> : vector<16x8xf32>
    %67 = tpu.matmul %4, %66, %cst_52 {dimension_numbers = #tpu.dot_dimension_numbers<[1], [0], [0], [1], [0, 0, 1, 1], [], []>} : vector<16x32xbf16>, vector<32x8xbf16>, vector<16x8xf32> -> vector<16x8xf32>
    %c0_53 = arith.constant 0 : index
    %c1_54 = arith.constant 1 : index
    %c0_55 = arith.constant 0 : index
    %c0_56 = arith.constant 0 : index
    %68 = vector.load %arg9[%c0_53, %c1_54, %c0_55, %c0_56] : memref<1x4x1x8xf32, #tpu.memory_space<vmem>>, vector<1x1x1x8xf32>
    %69 = vector.shape_cast %68 : vector<1x1x1x8xf32> to vector<1x8xf32>
    %70 = vector.broadcast %69 : vector<1x8xf32> to vector<16x8xf32>
    %71 = arith.addf %67, %70 : vector<16x8xf32>
    %72 = vector.shape_cast %71 : vector<16x8xf32> to vector<2x8x8xf32>
    %c0_57 = arith.constant 0 : index
    %c1_58 = arith.constant 1 : index
    %c0_59 = arith.constant 0 : index
    %c0_60 = arith.constant 0 : index
    %73 = vector.load %arg10[%c0_57, %c1_58, %c0_59, %c0_60] : memref<1x4x32x8xbf16, #tpu.memory_space<vmem>>, vector<1x1x32x8xbf16>
    %74 = vector.shape_cast %73 : vector<1x1x32x8xbf16> to vector<32x8xbf16>
    %cst_61 = arith.constant dense<0.000000e+00> : vector<16x8xf32>
    %75 = tpu.matmul %4, %74, %cst_61 {dimension_numbers = #tpu.dot_dimension_numbers<[1], [0], [0], [1], [0, 0, 1, 1], [], []>} : vector<16x32xbf16>, vector<32x8xbf16>, vector<16x8xf32> -> vector<16x8xf32>
    %c0_62 = arith.constant 0 : index
    %c1_63 = arith.constant 1 : index
    %c0_64 = arith.constant 0 : index
    %c0_65 = arith.constant 0 : index
    %76 = vector.load %arg11[%c0_62, %c1_63, %c0_64, %c0_65] : memref<1x4x1x8xf32, #tpu.memory_space<vmem>>, vector<1x1x1x8xf32>
    %77 = vector.shape_cast %76 : vector<1x1x1x8xf32> to vector<1x8xf32>
    %78 = vector.broadcast %77 : vector<1x8xf32> to vector<16x8xf32>
    %79 = arith.addf %75, %78 : vector<16x8xf32>
    %80 = vector.shape_cast %79 : vector<16x8xf32> to vector<2x8x8xf32>
    %81 = arith.truncf %64 : vector<2x8x8xf32> to vector<2x8x8xbf16>
    %82 = arith.truncf %72 : vector<2x8x8xf32> to vector<2x8x8xbf16>
    "tpu.trace_start"() <{level = 10 : i32, message = "bqd,bkd->bqk"}> : () -> ()
    %cst_66 = arith.constant dense<0.000000e+00> : vector<2x8x8xf32>
    %83 = tpu.matmul %81, %82, %cst_66 {dimension_numbers = #tpu.dot_dimension_numbers<[2], [2], [1], [1], [0, 0, 0, 1, 1, 1], [0], [0]>} : vector<2x8x8xbf16>, vector<2x8x8xbf16>, vector<2x8x8xf32> -> vector<2x8x8xf32>
    "tpu.trace_stop"() : () -> ()
    %84 = arith.addf %83, %8 : vector<2x8x8xf32>
    %cst_67 = arith.constant dense<0xFF800000> : vector<2x8xf32>
    %85 = vector.multi_reduction <maximumf>, %84, %cst_67 [2] : vector<2x8x8xf32> to vector<2x8xf32>
    %86 = vector.shape_cast %85 : vector<2x8xf32> to vector<2x8x1xf32>
    %87 = vector.broadcast %86 : vector<2x8x1xf32> to vector<2x8x8xf32>
    %88 = arith.subf %84, %87 : vector<2x8x8xf32>
    %89 = math.exp %88 : vector<2x8x8xf32>
    %cst_68 = arith.constant dense<0.000000e+00> : vector<2x8xf32>
    %90 = vector.multi_reduction <add>, %89, %cst_68 [2] : vector<2x8x8xf32> to vector<2x8xf32>
    %91 = vector.shape_cast %90 : vector<2x8xf32> to vector<2x8x1xf32>
    %92 = tpu.reciprocal %91 {approx = true} : vector<2x8x1xf32> -> vector<2x8x1xf32>
    %93 = vector.broadcast %92 : vector<2x8x1xf32> to vector<2x8x8xf32>
    %94 = arith.mulf %89, %93 : vector<2x8x8xf32>
    %95 = arith.truncf %94 : vector<2x8x8xf32> to vector<2x8x8xbf16>
    %96 = arith.truncf %80 : vector<2x8x8xf32> to vector<2x8x8xbf16>
    "tpu.trace_start"() <{level = 10 : i32, message = "bqk,bkd->bqd"}> : () -> ()
    %cst_69 = arith.constant dense<0.000000e+00> : vector<2x8x8xf32>
    %97 = tpu.matmul %95, %96, %cst_69 {dimension_numbers = #tpu.dot_dimension_numbers<[2], [1], [1], [2], [0, 0, 0, 1, 1, 2], [0], [0]>} : vector<2x8x8xbf16>, vector<2x8x8xbf16>, vector<2x8x8xf32> -> vector<2x8x8xf32>
    "tpu.trace_stop"() : () -> ()
    %98 = vector.shape_cast %97 : vector<2x8x8xf32> to vector<16x8xf32>
    %99 = arith.truncf %98 : vector<16x8xf32> to vector<16x8xbf16>
    %c0_70 = arith.constant 0 : index
    %c1_71 = arith.constant 1 : index
    %c0_72 = arith.constant 0 : index
    %c0_73 = arith.constant 0 : index
    %100 = vector.load %arg12[%c0_70, %c1_71, %c0_72, %c0_73] : memref<1x4x8x32xbf16, #tpu.memory_space<vmem>>, vector<1x1x8x32xbf16>
    %101 = vector.shape_cast %100 : vector<1x1x8x32xbf16> to vector<8x32xbf16>
    %cst_74 = arith.constant dense<0.000000e+00> : vector<16x32xf32>
    %102 = tpu.matmul %99, %101, %cst_74 {dimension_numbers = #tpu.dot_dimension_numbers<[1], [0], [0], [1], [0, 0, 1, 1], [], []>} : vector<16x8xbf16>, vector<8x32xbf16>, vector<16x32xf32> -> vector<16x32xf32>
    %103 = arith.addf %56, %102 : vector<16x32xf32>
    %c0_75 = arith.constant 0 : index
    %c2 = arith.constant 2 : index
    %c0_76 = arith.constant 0 : index
    %c0_77 = arith.constant 0 : index
    %104 = vector.load %arg6[%c0_75, %c2, %c0_76, %c0_77] : memref<1x4x32x8xbf16, #tpu.memory_space<vmem>>, vector<1x1x32x8xbf16>
    %105 = vector.shape_cast %104 : vector<1x1x32x8xbf16> to vector<32x8xbf16>
    %cst_78 = arith.constant dense<0.000000e+00> : vector<16x8xf32>
    %106 = tpu.matmul %4, %105, %cst_78 {dimension_numbers = #tpu.dot_dimension_numbers<[1], [0], [0], [1], [0, 0, 1, 1], [], []>} : vector<16x32xbf16>, vector<32x8xbf16>, vector<16x8xf32> -> vector<16x8xf32>
    %c0_79 = arith.constant 0 : index
    %c2_80 = arith.constant 2 : index
    %c0_81 = arith.constant 0 : index
    %c0_82 = arith.constant 0 : index
    %107 = vector.load %arg7[%c0_79, %c2_80, %c0_81, %c0_82] : memref<1x4x1x8xf32, #tpu.memory_space<vmem>>, vector<1x1x1x8xf32>
    %108 = vector.shape_cast %107 : vector<1x1x1x8xf32> to vector<1x8xf32>
    %109 = vector.broadcast %108 : vector<1x8xf32> to vector<16x8xf32>
    %110 = arith.addf %106, %109 : vector<16x8xf32>
    %111 = vector.shape_cast %110 : vector<16x8xf32> to vector<2x8x8xf32>
    %c0_83 = arith.constant 0 : index
    %c2_84 = arith.constant 2 : index
    %c0_85 = arith.constant 0 : index
    %c0_86 = arith.constant 0 : index
    %112 = vector.load %arg8[%c0_83, %c2_84, %c0_85, %c0_86] : memref<1x4x32x8xbf16, #tpu.memory_space<vmem>>, vector<1x1x32x8xbf16>
    %113 = vector.shape_cast %112 : vector<1x1x32x8xbf16> to vector<32x8xbf16>
    %cst_87 = arith.constant dense<0.000000e+00> : vector<16x8xf32>
    %114 = tpu.matmul %4, %113, %cst_87 {dimension_numbers = #tpu.dot_dimension_numbers<[1], [0], [0], [1], [0, 0, 1, 1], [], []>} : vector<16x32xbf16>, vector<32x8xbf16>, vector<16x8xf32> -> vector<16x8xf32>
    %c0_88 = arith.constant 0 : index
    %c2_89 = arith.constant 2 : index
    %c0_90 = arith.constant 0 : index
    %c0_91 = arith.constant 0 : index
    %115 = vector.load %arg9[%c0_88, %c2_89, %c0_90, %c0_91] : memref<1x4x1x8xf32, #tpu.memory_space<vmem>>, vector<1x1x1x8xf32>
    %116 = vector.shape_cast %115 : vector<1x1x1x8xf32> to vector<1x8xf32>
    %117 = vector.broadcast %116 : vector<1x8xf32> to vector<16x8xf32>
    %118 = arith.addf %114, %117 : vector<16x8xf32>
    %119 = vector.shape_cast %118 : vector<16x8xf32> to vector<2x8x8xf32>
    %c0_92 = arith.constant 0 : index
    %c2_93 = arith.constant 2 : index
    %c0_94 = arith.constant 0 : index
    %c0_95 = arith.constant 0 : index
    %120 = vector.load %arg10[%c0_92, %c2_93, %c0_94, %c0_95] : memref<1x4x32x8xbf16, #tpu.memory_space<vmem>>, vector<1x1x32x8xbf16>
    %121 = vector.shape_cast %120 : vector<1x1x32x8xbf16> to vector<32x8xbf16>
    %cst_96 = arith.constant dense<0.000000e+00> : vector<16x8xf32>
    %122 = tpu.matmul %4, %121, %cst_96 {dimension_numbers = #tpu.dot_dimension_numbers<[1], [0], [0], [1], [0, 0, 1, 1], [], []>} : vector<16x32xbf16>, vector<32x8xbf16>, vector<16x8xf32> -> vector<16x8xf32>
    %c0_97 = arith.constant 0 : index
    %c2_98 = arith.constant 2 : index
    %c0_99 = arith.constant 0 : index
    %c0_100 = arith.constant 0 : index
    %123 = vector.load %arg11[%c0_97, %c2_98, %c0_99, %c0_100] : memref<1x4x1x8xf32, #tpu.memory_space<vmem>>, vector<1x1x1x8xf32>
    %124 = vector.shape_cast %123 : vector<1x1x1x8xf32> to vector<1x8xf32>
    %125 = vector.broadcast %124 : vector<1x8xf32> to vector<16x8xf32>
    %126 = arith.addf %122, %125 : vector<16x8xf32>
    %127 = vector.shape_cast %126 : vector<16x8xf32> to vector<2x8x8xf32>
    %128 = arith.truncf %111 : vector<2x8x8xf32> to vector<2x8x8xbf16>
    %129 = arith.truncf %119 : vector<2x8x8xf32> to vector<2x8x8xbf16>
    "tpu.trace_start"() <{level = 10 : i32, message = "bqd,bkd->bqk"}> : () -> ()
    %cst_101 = arith.constant dense<0.000000e+00> : vector<2x8x8xf32>
    %130 = tpu.matmul %128, %129, %cst_101 {dimension_numbers = #tpu.dot_dimension_numbers<[2], [2], [1], [1], [0, 0, 0, 1, 1, 1], [0], [0]>} : vector<2x8x8xbf16>, vector<2x8x8xbf16>, vector<2x8x8xf32> -> vector<2x8x8xf32>
    "tpu.trace_stop"() : () -> ()
    %131 = arith.addf %130, %8 : vector<2x8x8xf32>
    %cst_102 = arith.constant dense<0xFF800000> : vector<2x8xf32>
    %132 = vector.multi_reduction <maximumf>, %131, %cst_102 [2] : vector<2x8x8xf32> to vector<2x8xf32>
    %133 = vector.shape_cast %132 : vector<2x8xf32> to vector<2x8x1xf32>
    %134 = vector.broadcast %133 : vector<2x8x1xf32> to vector<2x8x8xf32>
    %135 = arith.subf %131, %134 : vector<2x8x8xf32>
    %136 = math.exp %135 : vector<2x8x8xf32>
    %cst_103 = arith.constant dense<0.000000e+00> : vector<2x8xf32>
    %137 = vector.multi_reduction <add>, %136, %cst_103 [2] : vector<2x8x8xf32> to vector<2x8xf32>
    %138 = vector.shape_cast %137 : vector<2x8xf32> to vector<2x8x1xf32>
    %139 = tpu.reciprocal %138 {approx = true} : vector<2x8x1xf32> -> vector<2x8x1xf32>
    %140 = vector.broadcast %139 : vector<2x8x1xf32> to vector<2x8x8xf32>
    %141 = arith.mulf %136, %140 : vector<2x8x8xf32>
    %142 = arith.truncf %141 : vector<2x8x8xf32> to vector<2x8x8xbf16>
    %143 = arith.truncf %127 : vector<2x8x8xf32> to vector<2x8x8xbf16>
    "tpu.trace_start"() <{level = 10 : i32, message = "bqk,bkd->bqd"}> : () -> ()
    %cst_104 = arith.constant dense<0.000000e+00> : vector<2x8x8xf32>
    %144 = tpu.matmul %142, %143, %cst_104 {dimension_numbers = #tpu.dot_dimension_numbers<[2], [1], [1], [2], [0, 0, 0, 1, 1, 2], [0], [0]>} : vector<2x8x8xbf16>, vector<2x8x8xbf16>, vector<2x8x8xf32> -> vector<2x8x8xf32>
    "tpu.trace_stop"() : () -> ()
    %145 = vector.shape_cast %144 : vector<2x8x8xf32> to vector<16x8xf32>
    %146 = arith.truncf %145 : vector<16x8xf32> to vector<16x8xbf16>
    %c0_105 = arith.constant 0 : index
    %c2_106 = arith.constant 2 : index
    %c0_107 = arith.constant 0 : index
    %c0_108 = arith.constant 0 : index
    %147 = vector.load %arg12[%c0_105, %c2_106, %c0_107, %c0_108] : memref<1x4x8x32xbf16, #tpu.memory_space<vmem>>, vector<1x1x8x32xbf16>
    %148 = vector.shape_cast %147 : vector<1x1x8x32xbf16> to vector<8x32xbf16>
    %cst_109 = arith.constant dense<0.000000e+00> : vector<16x32xf32>
    %149 = tpu.matmul %146, %148, %cst_109 {dimension_numbers = #tpu.dot_dimension_numbers<[1], [0], [0], [1], [0, 0, 1, 1], [], []>} : vector<16x8xbf16>, vector<8x32xbf16>, vector<16x32xf32> -> vector<16x32xf32>
    %150 = arith.addf %103, %149 : vector<16x32xf32>
    %c0_110 = arith.constant 0 : index
    %c3 = arith.constant 3 : index
    %c0_111 = arith.constant 0 : index
    %c0_112 = arith.constant 0 : index
    %151 = vector.load %arg6[%c0_110, %c3, %c0_111, %c0_112] : memref<1x4x32x8xbf16, #tpu.memory_space<vmem>>, vector<1x1x32x8xbf16>
    %152 = vector.shape_cast %151 : vector<1x1x32x8xbf16> to vector<32x8xbf16>
    %cst_113 = arith.constant dense<0.000000e+00> : vector<16x8xf32>
    %153 = tpu.matmul %4, %152, %cst_113 {dimension_numbers = #tpu.dot_dimension_numbers<[1], [0], [0], [1], [0, 0, 1, 1], [], []>} : vector<16x32xbf16>, vector<32x8xbf16>, vector<16x8xf32> -> vector<16x8xf32>
    %c0_114 = arith.constant 0 : index
    %c3_115 = arith.constant 3 : index
    %c0_116 = arith.constant 0 : index
    %c0_117 = arith.constant 0 : index
    %154 = vector.load %arg7[%c0_114, %c3_115, %c0_116, %c0_117] : memref<1x4x1x8xf32, #tpu.memory_space<vmem>>, vector<1x1x1x8xf32>
    %155 = vector.shape_cast %154 : vector<1x1x1x8xf32> to vector<1x8xf32>
    %156 = vector.broadcast %155 : vector<1x8xf32> to vector<16x8xf32>
    %157 = arith.addf %153, %156 : vector<16x8xf32>
    %158 = vector.shape_cast %157 : vector<16x8xf32> to vector<2x8x8xf32>
    %c0_118 = arith.constant 0 : index
    %c3_119 = arith.constant 3 : index
    %c0_120 = arith.constant 0 : index
    %c0_121 = arith.constant 0 : index
    %159 = vector.load %arg8[%c0_118, %c3_119, %c0_120, %c0_121] : memref<1x4x32x8xbf16, #tpu.memory_space<vmem>>, vector<1x1x32x8xbf16>
    %160 = vector.shape_cast %159 : vector<1x1x32x8xbf16> to vector<32x8xbf16>
    %cst_122 = arith.constant dense<0.000000e+00> : vector<16x8xf32>
    %161 = tpu.matmul %4, %160, %cst_122 {dimension_numbers = #tpu.dot_dimension_numbers<[1], [0], [0], [1], [0, 0, 1, 1], [], []>} : vector<16x32xbf16>, vector<32x8xbf16>, vector<16x8xf32> -> vector<16x8xf32>
    %c0_123 = arith.constant 0 : index
    %c3_124 = arith.constant 3 : index
    %c0_125 = arith.constant 0 : index
    %c0_126 = arith.constant 0 : index
    %162 = vector.load %arg9[%c0_123, %c3_124, %c0_125, %c0_126] : memref<1x4x1x8xf32, #tpu.memory_space<vmem>>, vector<1x1x1x8xf32>
    %163 = vector.shape_cast %162 : vector<1x1x1x8xf32> to vector<1x8xf32>
    %164 = vector.broadcast %163 : vector<1x8xf32> to vector<16x8xf32>
    %165 = arith.addf %161, %164 : vector<16x8xf32>
    %166 = vector.shape_cast %165 : vector<16x8xf32> to vector<2x8x8xf32>
    %c0_127 = arith.constant 0 : index
    %c3_128 = arith.constant 3 : index
    %c0_129 = arith.constant 0 : index
    %c0_130 = arith.constant 0 : index
    %167 = vector.load %arg10[%c0_127, %c3_128, %c0_129, %c0_130] : memref<1x4x32x8xbf16, #tpu.memory_space<vmem>>, vector<1x1x32x8xbf16>
    %168 = vector.shape_cast %167 : vector<1x1x32x8xbf16> to vector<32x8xbf16>
    %cst_131 = arith.constant dense<0.000000e+00> : vector<16x8xf32>
    %169 = tpu.matmul %4, %168, %cst_131 {dimension_numbers = #tpu.dot_dimension_numbers<[1], [0], [0], [1], [0, 0, 1, 1], [], []>} : vector<16x32xbf16>, vector<32x8xbf16>, vector<16x8xf32> -> vector<16x8xf32>
    %c0_132 = arith.constant 0 : index
    %c3_133 = arith.constant 3 : index
    %c0_134 = arith.constant 0 : index
    %c0_135 = arith.constant 0 : index
    %170 = vector.load %arg11[%c0_132, %c3_133, %c0_134, %c0_135] : memref<1x4x1x8xf32, #tpu.memory_space<vmem>>, vector<1x1x1x8xf32>
    %171 = vector.shape_cast %170 : vector<1x1x1x8xf32> to vector<1x8xf32>
    %172 = vector.broadcast %171 : vector<1x8xf32> to vector<16x8xf32>
    %173 = arith.addf %169, %172 : vector<16x8xf32>
    %174 = vector.shape_cast %173 : vector<16x8xf32> to vector<2x8x8xf32>
    %175 = arith.truncf %158 : vector<2x8x8xf32> to vector<2x8x8xbf16>
    %176 = arith.truncf %166 : vector<2x8x8xf32> to vector<2x8x8xbf16>
    "tpu.trace_start"() <{level = 10 : i32, message = "bqd,bkd->bqk"}> : () -> ()
    %cst_136 = arith.constant dense<0.000000e+00> : vector<2x8x8xf32>
    %177 = tpu.matmul %175, %176, %cst_136 {dimension_numbers = #tpu.dot_dimension_numbers<[2], [2], [1], [1], [0, 0, 0, 1, 1, 1], [0], [0]>} : vector<2x8x8xbf16>, vector<2x8x8xbf16>, vector<2x8x8xf32> -> vector<2x8x8xf32>
    "tpu.trace_stop"() : () -> ()
    %178 = arith.addf %177, %8 : vector<2x8x8xf32>
    %cst_137 = arith.constant dense<0xFF800000> : vector<2x8xf32>
    %179 = vector.multi_reduction <maximumf>, %178, %cst_137 [2] : vector<2x8x8xf32> to vector<2x8xf32>
    %180 = vector.shape_cast %179 : vector<2x8xf32> to vector<2x8x1xf32>
    %181 = vector.broadcast %180 : vector<2x8x1xf32> to vector<2x8x8xf32>
    %182 = arith.subf %178, %181 : vector<2x8x8xf32>
    %183 = math.exp %182 : vector<2x8x8xf32>
    %cst_138 = arith.constant dense<0.000000e+00> : vector<2x8xf32>
    %184 = vector.multi_reduction <add>, %183, %cst_138 [2] : vector<2x8x8xf32> to vector<2x8xf32>
    %185 = vector.shape_cast %184 : vector<2x8xf32> to vector<2x8x1xf32>
    %186 = tpu.reciprocal %185 {approx = true} : vector<2x8x1xf32> -> vector<2x8x1xf32>
    %187 = vector.broadcast %186 : vector<2x8x1xf32> to vector<2x8x8xf32>
    %188 = arith.mulf %183, %187 : vector<2x8x8xf32>
    %189 = arith.truncf %188 : vector<2x8x8xf32> to vector<2x8x8xbf16>
    %190 = arith.truncf %174 : vector<2x8x8xf32> to vector<2x8x8xbf16>
    "tpu.trace_start"() <{level = 10 : i32, message = "bqk,bkd->bqd"}> : () -> ()
    %cst_139 = arith.constant dense<0.000000e+00> : vector<2x8x8xf32>
    %191 = tpu.matmul %189, %190, %cst_139 {dimension_numbers = #tpu.dot_dimension_numbers<[2], [1], [1], [2], [0, 0, 0, 1, 1, 2], [0], [0]>} : vector<2x8x8xbf16>, vector<2x8x8xbf16>, vector<2x8x8xf32> -> vector<2x8x8xf32>
    "tpu.trace_stop"() : () -> ()
    %192 = vector.shape_cast %191 : vector<2x8x8xf32> to vector<16x8xf32>
    %193 = arith.truncf %192 : vector<16x8xf32> to vector<16x8xbf16>
    %c0_140 = arith.constant 0 : index
    %c3_141 = arith.constant 3 : index
    %c0_142 = arith.constant 0 : index
    %c0_143 = arith.constant 0 : index
    %194 = vector.load %arg12[%c0_140, %c3_141, %c0_142, %c0_143] : memref<1x4x8x32xbf16, #tpu.memory_space<vmem>>, vector<1x1x8x32xbf16>
    %195 = vector.shape_cast %194 : vector<1x1x8x32xbf16> to vector<8x32xbf16>
    %cst_144 = arith.constant dense<0.000000e+00> : vector<16x32xf32>
    %196 = tpu.matmul %193, %195, %cst_144 {dimension_numbers = #tpu.dot_dimension_numbers<[1], [0], [0], [1], [0, 0, 1, 1], [], []>} : vector<16x8xbf16>, vector<8x32xbf16>, vector<16x32xf32> -> vector<16x32xf32>
    %197 = arith.addf %150, %196 : vector<16x32xf32>
    %c0_145 = arith.constant 0 : index
    %c0_146 = arith.constant 0 : index
    %c0_147 = arith.constant 0 : index
    %c0_148 = arith.constant 0 : index
    %198 = vector.load %arg13[%c0_145, %c0_146, %c0_147, %c0_148] : memref<1x1x1x32xf32, #tpu.memory_space<vmem>>, vector<1x1x1x32xf32>
    %199 = vector.shape_cast %198 : vector<1x1x1x32xf32> to vector<1x32xf32>
    %200 = vector.broadcast %199 : vector<1x32xf32> to vector<16x32xf32>
    %201 = arith.addf %197, %200 : vector<16x32xf32>
    %202 = arith.addf %3, %201 : vector<16x32xf32>
    %c0_149 = arith.constant 0 : index
    %c0_150 = arith.constant 0 : index
    %c0_151 = arith.constant 0 : index
    %c0_152 = arith.constant 0 : index
    %203 = vector.load %arg14[%c0_149, %c0_150, %c0_151, %c0_152] : memref<1x1x1x32xf32, #tpu.memory_space<vmem>>, vector<1x1x1x32xf32>
    %204 = vector.shape_cast %203 : vector<1x1x1x32xf32> to vector<1x32xf32>
    %c0_153 = arith.constant 0 : index
    %c0_154 = arith.constant 0 : index
    %c0_155 = arith.constant 0 : index
    %c0_156 = arith.constant 0 : index
    %205 = vector.load %arg15[%c0_153, %c0_154, %c0_155, %c0_156] : memref<1x1x1x32xf32, #tpu.memory_space<vmem>>, vector<1x1x1x32xf32>
    %206 = vector.shape_cast %205 : vector<1x1x1x32xf32> to vector<1x32xf32>
    %cst_157 = arith.constant dense<0.000000e+00> : vector<16xf32>
    %207 = vector.multi_reduction <add>, %202, %cst_157 [1] : vector<16x32xf32> to vector<16xf32>
    %208 = vector.shape_cast %207 : vector<16xf32> to vector<16x1xf32>
    %cst_158 = arith.constant 3.200000e+01 : f32
    %209 = vector.broadcast %cst_158 : f32 to vector<16x1xf32>
    %210 = arith.divf %208, %209 : vector<16x1xf32>
    %211 = vector.broadcast %210 : vector<16x1xf32> to vector<16x32xf32>
    %212 = arith.subf %202, %211 : vector<16x32xf32>
    %213 = arith.mulf %212, %212 : vector<16x32xf32>
    %cst_159 = arith.constant dense<0.000000e+00> : vector<16xf32>
    %214 = vector.multi_reduction <add>, %213, %cst_159 [1] : vector<16x32xf32> to vector<16xf32>
    %215 = vector.shape_cast %214 : vector<16xf32> to vector<16x1xf32>
    %cst_160 = arith.constant 3.200000e+01 : f32
    %216 = vector.broadcast %cst_160 : f32 to vector<16x1xf32>
    %217 = arith.divf %215, %216 : vector<16x1xf32>
    %218 = vector.broadcast %210 : vector<16x1xf32> to vector<16x32xf32>
    %219 = arith.subf %202, %218 : vector<16x32xf32>
    %cst_161 = arith.constant 9.99999974E-6 : f32
    %220 = vector.broadcast %cst_161 : f32 to vector<16x1xf32>
    %221 = arith.addf %217, %220 : vector<16x1xf32>
    %222 = math.rsqrt %221 : vector<16x1xf32>
    %223 = vector.broadcast %222 : vector<16x1xf32> to vector<16x32xf32>
    %224 = arith.mulf %219, %223 : vector<16x32xf32>
    %225 = vector.broadcast %204 : vector<1x32xf32> to vector<16x32xf32>
    %226 = arith.mulf %224, %225 : vector<16x32xf32>
    %227 = vector.broadcast %206 : vector<1x32xf32> to vector<16x32xf32>
    %228 = arith.addf %226, %227 : vector<16x32xf32>
    %229 = arith.truncf %228 : vector<16x32xf32> to vector<16x32xbf16>
    %c0_162 = arith.constant 0 : index
    %c0_163 = arith.constant 0 : index
    %c0_164 = arith.constant 0 : index
    %c0_165 = arith.constant 0 : index
    %230 = vector.load %arg16[%c0_162, %c0_163, %c0_164, %c0_165] : memref<1x1x32x128xbf16, #tpu.memory_space<vmem>>, vector<1x1x32x128xbf16>
    %231 = vector.shape_cast %230 : vector<1x1x32x128xbf16> to vector<32x128xbf16>
    %cst_166 = arith.constant dense<0.000000e+00> : vector<16x128xf32>
    %232 = tpu.matmul %229, %231, %cst_166 {dimension_numbers = #tpu.dot_dimension_numbers<[1], [0], [0], [1], [0, 0, 1, 1], [], []>} : vector<16x32xbf16>, vector<32x128xbf16>, vector<16x128xf32> -> vector<16x128xf32>
    %c0_167 = arith.constant 0 : index
    %c0_168 = arith.constant 0 : index
    %c0_169 = arith.constant 0 : index
    %c0_170 = arith.constant 0 : index
    %233 = vector.load %arg17[%c0_167, %c0_168, %c0_169, %c0_170] : memref<1x1x1x128xf32, #tpu.memory_space<vmem>>, vector<1x1x1x128xf32>
    %234 = vector.shape_cast %233 : vector<1x1x1x128xf32> to vector<1x128xf32>
    %235 = vector.broadcast %234 : vector<1x128xf32> to vector<16x128xf32>
    %236 = arith.addf %232, %235 : vector<16x128xf32>
    %cst_171 = arith.constant 0.000000e+00 : f32
    %237 = vector.broadcast %cst_171 : f32 to vector<16x128xf32>
    %238 = arith.maximumf %236, %237 : vector<16x128xf32>
    %239 = arith.truncf %238 : vector<16x128xf32> to vector<16x128xbf16>
    %c0_172 = arith.constant 0 : index
    %c0_173 = arith.constant 0 : index
    %c0_174 = arith.constant 0 : index
    %c0_175 = arith.constant 0 : index
    %240 = vector.load %arg18[%c0_172, %c0_173, %c0_174, %c0_175] : memref<1x1x128x32xbf16, #tpu.memory_space<vmem>>, vector<1x1x128x32xbf16>
    %241 = vector.shape_cast %240 : vector<1x1x128x32xbf16> to vector<128x32xbf16>
    %cst_176 = arith.constant dense<0.000000e+00> : vector<16x32xf32>
    %242 = tpu.matmul %239, %241, %cst_176 {dimension_numbers = #tpu.dot_dimension_numbers<[1], [0], [0], [1], [0, 0, 1, 1], [], []>} : vector<16x128xbf16>, vector<128x32xbf16>, vector<16x32xf32> -> vector<16x32xf32>
    %c0_177 = arith.constant 0 : index
    %c0_178 = arith.constant 0 : index
    %c0_179 = arith.constant 0 : index
    %c0_180 = arith.constant 0 : index
    %243 = vector.load %arg19[%c0_177, %c0_178, %c0_179, %c0_180] : memref<1x1x1x32xf32, #tpu.memory_space<vmem>>, vector<1x1x1x32xf32>
    %244 = vector.shape_cast %243 : vector<1x1x1x32xf32> to vector<1x32xf32>
    %245 = vector.broadcast %244 : vector<1x32xf32> to vector<16x32xf32>
    %246 = arith.addf %242, %245 : vector<16x32xf32>
    %247 = arith.addf %228, %246 : vector<16x32xf32>
    %c0_181 = arith.constant 0 : index
    %c0_182 = arith.constant 0 : index
    %c0_183 = arith.constant 0 : index
    %c0_184 = arith.constant 0 : index
    %248 = vector.load %arg20[%c0_181, %c0_182, %c0_183, %c0_184] : memref<1x1x1x32xf32, #tpu.memory_space<vmem>>, vector<1x1x1x32xf32>
    %249 = vector.shape_cast %248 : vector<1x1x1x32xf32> to vector<1x32xf32>
    %c0_185 = arith.constant 0 : index
    %c0_186 = arith.constant 0 : index
    %c0_187 = arith.constant 0 : index
    %c0_188 = arith.constant 0 : index
    %250 = vector.load %arg21[%c0_185, %c0_186, %c0_187, %c0_188] : memref<1x1x1x32xf32, #tpu.memory_space<vmem>>, vector<1x1x1x32xf32>
    %251 = vector.shape_cast %250 : vector<1x1x1x32xf32> to vector<1x32xf32>
    %cst_189 = arith.constant dense<0.000000e+00> : vector<16xf32>
    %252 = vector.multi_reduction <add>, %247, %cst_189 [1] : vector<16x32xf32> to vector<16xf32>
    %253 = vector.shape_cast %252 : vector<16xf32> to vector<16x1xf32>
    %cst_190 = arith.constant 3.200000e+01 : f32
    %254 = vector.broadcast %cst_190 : f32 to vector<16x1xf32>
    %255 = arith.divf %253, %254 : vector<16x1xf32>
    %256 = vector.broadcast %255 : vector<16x1xf32> to vector<16x32xf32>
    %257 = arith.subf %247, %256 : vector<16x32xf32>
    %258 = arith.mulf %257, %257 : vector<16x32xf32>
    %cst_191 = arith.constant dense<0.000000e+00> : vector<16xf32>
    %259 = vector.multi_reduction <add>, %258, %cst_191 [1] : vector<16x32xf32> to vector<16xf32>
    %260 = vector.shape_cast %259 : vector<16xf32> to vector<16x1xf32>
    %cst_192 = arith.constant 3.200000e+01 : f32
    %261 = vector.broadcast %cst_192 : f32 to vector<16x1xf32>
    %262 = arith.divf %260, %261 : vector<16x1xf32>
    %263 = vector.broadcast %255 : vector<16x1xf32> to vector<16x32xf32>
    %264 = arith.subf %247, %263 : vector<16x32xf32>
    %cst_193 = arith.constant 9.99999974E-6 : f32
    %265 = vector.broadcast %cst_193 : f32 to vector<16x1xf32>
    %266 = arith.addf %262, %265 : vector<16x1xf32>
    %267 = math.rsqrt %266 : vector<16x1xf32>
    %268 = vector.broadcast %267 : vector<16x1xf32> to vector<16x32xf32>
    %269 = arith.mulf %264, %268 : vector<16x32xf32>
    %270 = vector.broadcast %249 : vector<1x32xf32> to vector<16x32xf32>
    %271 = arith.mulf %269, %270 : vector<16x32xf32>
    %272 = vector.broadcast %251 : vector<1x32xf32> to vector<16x32xf32>
    %273 = arith.addf %271, %272 : vector<16x32xf32>
    %c0_194 = arith.constant 0 : index
    %c0_195 = arith.constant 0 : index
    %274 = vector.load %arg23[%c0_194, %c0_195] : memref<16x32xf32, #tpu.memory_space<vmem>>, vector<16x32xf32>
    tpu.vector_store %arg23[%c0_194, %c0_195], %273 {strides = array<i32>} : memref<16x32xf32, #tpu.memory_space<vmem>>, vector<16x32xf32>,
    %c1_i32 = arith.constant 1 : i32
    %275 = arith.cmpi eq, %arg1, %c1_i32 : i32
    %276 = arith.extui %275 : i1 to i32
    %c0_i32_196 = arith.constant 0 : i32
    %277 = arith.cmpi ne, %276, %c0_i32_196 : i32
    scf.if %277 {
      %c0_197 = arith.constant 0 : index
      %c0_198 = arith.constant 0 : index
      %278 = vector.load %arg24[%c0_197, %c0_198] : memref<2x8xf32, #tpu.memory_space<vmem>>, vector<2x8xf32>
      %cst_199 = arith.constant 0.000000e+00 : f32
      %279 = vector.broadcast %cst_199 : f32 to vector<2x8xf32>
      %280 = arith.cmpf oeq, %278, %279 : vector<2x8xf32>
      %281 = arith.extui %280 : vector<2x8xi1> to vector<2x8xi32>
      %282 = arith.sitofp %281 : vector<2x8xi32> to vector<2x8xf32>
      %283 = vector.shape_cast %282 : vector<2x8xf32> to vector<2x8x1xf32>
      %284 = vector.shape_cast %273 : vector<16x32xf32> to vector<2x8x32xf32>
      %285 = vector.broadcast %283 : vector<2x8x1xf32> to vector<2x8x32xf32>
      %286 = arith.mulf %284, %285 : vector<2x8x32xf32>
      %cst_200 = arith.constant dense<0.000000e+00> : vector<2x32xf32>
      %287 = vector.multi_reduction <add>, %286, %cst_200 [1] : vector<2x8x32xf32> to vector<2x32xf32>
      %cst_201 = arith.constant dense<0.000000e+00> : vector<2x1xf32>
      %288 = vector.multi_reduction <add>, %283, %cst_201 [1] : vector<2x8x1xf32> to vector<2x1xf32>
      %cst_202 = arith.constant 1.000000e+00 : f32
      %289 = vector.broadcast %cst_202 : f32 to vector<2x1xf32>
      %290 = arith.maximumf %288, %289 : vector<2x1xf32>
      %291 = vector.broadcast %290 : vector<2x1xf32> to vector<2x32xf32>
      %292 = arith.divf %287, %291 : vector<2x32xf32>
      %c0_203 = arith.constant 0 : index
      %c0_204 = arith.constant 0 : index
      %c0_205 = arith.constant 0 : index
      %293 = vector.load %arg22[%c0_203, %c0_204, %c0_205] : memref<1x2x32xf32, #tpu.memory_space<vmem>>, vector<1x2x32xf32>
      %294 = vector.shape_cast %293 : vector<1x2x32xf32> to vector<2x32xf32>
      %295 = vector.shape_cast %292 : vector<2x32xf32> to vector<1x2x32xf32>
      tpu.vector_store %arg22[%c0_203, %c0_204, %c0_205], %295 {strides = array<i32>} : memref<1x2x32xf32, #tpu.memory_space<vmem>>, vector<1x2x32xf32>,
    } else {
    }
    return
  }
  func.func @transform_0(%arg0: i32, %arg1: i32) -> (i32, i32, i32, i32) {
    %c0_i32 = arith.constant 0 : i32
    %c0_i32_0 = arith.constant 0 : i32
    %c0_i32_1 = arith.constant 0 : i32
    %c0_i32_2 = arith.constant 0 : i32
    return %arg0, %c0_i32, %c0_i32_0, %c0_i32_1 : i32, i32, i32, i32
  }
  func.func @transform_1(%arg0: i32, %arg1: i32) -> (i32, i32, i32) {
    %c0_i32 = arith.constant 0 : i32
    %c0_i32_0 = arith.constant 0 : i32
    %c0_i32_1 = arith.constant 0 : i32
    return %arg0, %c0_i32, %c0_i32_0 : i32, i32, i32
  }
  func.func @transform_2(%arg0: i32, %arg1: i32) -> (i32, i32, i32) {
    %c0_i32 = arith.constant 0 : i32
    %c0_i32_0 = arith.constant 0 : i32
    %c0_i32_1 = arith.constant 0 : i32
    return %arg0, %c0_i32, %c0_i32_0 : i32, i32, i32
  }
  func.func @transform_3(%arg0: i32, %arg1: i32) -> (i32, i32, i32) {
    %c0_i32 = arith.constant 0 : i32
    %c0_i32_0 = arith.constant 0 : i32
    %c0_i32_1 = arith.constant 0 : i32
    return %arg0, %c0_i32, %c0_i32_0 : i32, i32, i32
  }
  func.func @transform_4(%arg0: i32, %arg1: i32) -> (i32, i32, i32, i32) {
    %c0_i32 = arith.constant 0 : i32
    %c0_i32_0 = arith.constant 0 : i32
    %c0_i32_1 = arith.constant 0 : i32
    return %arg0, %arg1, %c0_i32, %c0_i32_0 : i32, i32, i32, i32
  }
  func.func @transform_5(%arg0: i32, %arg1: i32) -> (i32, i32, i32, i32) {
    %c0_i32 = arith.constant 0 : i32
    %c0_i32_0 = arith.constant 0 : i32
    %c0_i32_1 = arith.constant 0 : i32
    return %arg0, %arg1, %c0_i32, %c0_i32_0 : i32, i32, i32, i32
  }
  func.func @transform_6(%arg0: i32, %arg1: i32) -> (i32, i32, i32, i32) {
    %c0_i32 = arith.constant 0 : i32
    %c0_i32_0 = arith.constant 0 : i32
    %c0_i32_1 = arith.constant 0 : i32
    return %arg0, %arg1, %c0_i32, %c0_i32_0 : i32, i32, i32, i32
  }
  func.func @transform_7(%arg0: i32, %arg1: i32) -> (i32, i32, i32, i32) {
    %c0_i32 = arith.constant 0 : i32
    %c0_i32_0 = arith.constant 0 : i32
    %c0_i32_1 = arith.constant 0 : i32
    return %arg0, %arg1, %c0_i32, %c0_i32_0 : i32, i32, i32, i32
  }
  func.func @transform_8(%arg0: i32, %arg1: i32) -> (i32, i32, i32, i32) {
    %c0_i32 = arith.constant 0 : i32
    %c0_i32_0 = arith.constant 0 : i32
    %c0_i32_1 = arith.constant 0 : i32
    return %arg0, %arg1, %c0_i32, %c0_i32_0 : i32, i32, i32, i32
  }
  func.func @transform_9(%arg0: i32, %arg1: i32) -> (i32, i32, i32, i32) {
    %c0_i32 = arith.constant 0 : i32
    %c0_i32_0 = arith.constant 0 : i32
    %c0_i32_1 = arith.constant 0 : i32
    return %arg0, %arg1, %c0_i32, %c0_i32_0 : i32, i32, i32, i32
  }
  func.func @transform_10(%arg0: i32, %arg1: i32) -> (i32, i32, i32, i32) {
    %c0_i32 = arith.constant 0 : i32
    %c0_i32_0 = arith.constant 0 : i32
    %c0_i32_1 = arith.constant 0 : i32
    return %arg0, %arg1, %c0_i32, %c0_i32_0 : i32, i32, i32, i32
  }
  func.func @transform_11(%arg0: i32, %arg1: i32) -> (i32, i32, i32, i32) {
    %c0_i32 = arith.constant 0 : i32
    %c0_i32_0 = arith.constant 0 : i32
    %c0_i32_1 = arith.constant 0 : i32
    return %arg0, %arg1, %c0_i32, %c0_i32_0 : i32, i32, i32, i32
  }
  func.func @transform_12(%arg0: i32, %arg1: i32) -> (i32, i32, i32, i32) {
    %c0_i32 = arith.constant 0 : i32
    %c0_i32_0 = arith.constant 0 : i32
    %c0_i32_1 = arith.constant 0 : i32
    return %arg0, %arg1, %c0_i32, %c0_i32_0 : i32, i32, i32, i32
  }
  func.func @transform_13(%arg0: i32, %arg1: i32) -> (i32, i32, i32, i32) {
    %c0_i32 = arith.constant 0 : i32
    %c0_i32_0 = arith.constant 0 : i32
    %c0_i32_1 = arith.constant 0 : i32
    return %arg0, %arg1, %c0_i32, %c0_i32_0 : i32, i32, i32, i32
  }
  func.func @transform_14(%arg0: i32, %arg1: i32) -> (i32, i32, i32, i32) {
    %c0_i32 = arith.constant 0 : i32
    %c0_i32_0 = arith.constant 0 : i32
    %c0_i32_1 = arith.constant 0 : i32
    return %arg0, %arg1, %c0_i32, %c0_i32_0 : i32, i32, i32, i32
  }
  func.func @transform_15(%arg0: i32, %arg1: i32) -> (i32, i32, i32, i32) {
    %c0_i32 = arith.constant 0 : i32
    %c0_i32_0 = arith.constant 0 : i32
    %c0_i32_1 = arith.constant 0 : i32
    return %arg0, %arg1, %c0_i32, %c0_i32_0 : i32, i32, i32, i32
  }
  func.func @transform_16(%arg0: i32, %arg1: i32) -> (i32, i32, i32, i32) {
    %c0_i32 = arith.constant 0 : i32
    %c0_i32_0 = arith.constant 0 : i32
    %c0_i32_1 = arith.constant 0 : i32
    return %arg0, %arg1, %c0_i32, %c0_i32_0 : i32, i32, i32, i32
  }
  func.func @transform_17(%arg0: i32, %arg1: i32) -> (i32, i32, i32, i32) {
    %c0_i32 = arith.constant 0 : i32
    %c0_i32_0 = arith.constant 0 : i32
    %c0_i32_1 = arith.constant 0 : i32
    return %arg0, %arg1, %c0_i32, %c0_i32_0 : i32, i32, i32, i32
  }
  func.func @transform_18(%arg0: i32, %arg1: i32) -> (i32, i32, i32, i32) {
    %c0_i32 = arith.constant 0 : i32
    %c0_i32_0 = arith.constant 0 : i32
    %c0_i32_1 = arith.constant 0 : i32
    return %arg0, %arg1, %c0_i32, %c0_i32_0 : i32, i32, i32, i32
  }
  func.func @transform_19(%arg0: i32, %arg1: i32) -> (i32, i32, i32, i32) {
    %c0_i32 = arith.constant 0 : i32
    %c0_i32_0 = arith.constant 0 : i32
    %c0_i32_1 = arith.constant 0 : i32
    return %arg0, %arg1, %c0_i32, %c0_i32_0 : i32, i32, i32, i32
  }
  func.func @transform_20(%arg0: i32, %arg1: i32) -> (i32, i32, i32) {
    %c0_i32 = arith.constant 0 : i32
    %c0_i32_0 = arith.constant 0 : i32
    %c0_i32_1 = arith.constant 0 : i32
    return %arg0, %c0_i32, %c0_i32_0 : i32, i32, i32
  }
}

</mosaic_0001>

<bundles_post_ra>
// kernel: _lambda_.1
= control target key start
LH: loop header
LB: loop body
LE: loop exit
PB: predicated region body
PF: predicated region fallthrough
CT: control target
= control target key end

     0   :  { %s4635_s22 = smov 0   ;;  %s4637_s23 = smov 0   ;;  %s5215_s0 = inlined_call_operand.vmem [shape: bf16[2,2,8,1024], index: 0, kind: input, shape index: {}]   ;;  %s5216_s1 = inlined_call_operand.vmem [shape: f32[2,8,32], index: 1, kind: input, shape index: {}]   ;;  %s5217_s2 = inlined_call_operand.vmem [shape: bf16[2,1024,32], index: 2, kind: input, shape index: {}]   ;;  %s5218_s3 = inlined_call_operand.vmem [shape: f32[2,1,32], index: 3, kind: input, shape index: {}]   ;;  %s5219_s4 = inlined_call_operand.vmem [shape: bf16[2,8,32,8], index: 4, kind: input, shape index: {}]   ;;  %s5220_s5 = inlined_call_operand.vmem [shape: f32[2,8,1,8], index: 5, kind: input, shape index: {}]   ;;  %s5221_s6 = inlined_call_operand.vmem [shape: bf16[2,8,32,8], index: 6, kind: input, shape index: {}]   ;;  %s5222_s7 = inlined_call_operand.vmem [shape: f32[2,8,1,8], index: 7, kind: input, shape index: {}]   ;;  %s5223_s8 = inlined_call_operand.vmem [shape: bf16[2,8,32,8], index: 8, kind: input, shape index: {}]   ;;  %s5224_s9 = inlined_call_operand.vmem [shape: f32[2,8,1,8], index: 9, kind: input, shape index: {}]   ;;  %s5225_s10 = inlined_call_operand.vmem [shape: bf16[2,8,8,32], index: 10, kind: input, shape index: {}]   ;;  %s5226_s11 = inlined_call_operand.vmem [shape: f32[2,2,1,32], index: 11, kind: input, shape index: {}]   ;;  %s5227_s12 = inlined_call_operand.vmem [shape: f32[2,2,1,32], index: 12, kind: input, shape index: {}]   ;;  %s5228_s13 = inlined_call_operand.vmem [shape: f32[2,2,1,32], index: 13, kind: input, shape index: {}]   ;;  %s5229_s14 = inlined_call_operand.vmem [shape: bf16[2,2,32,128], index: 14, kind: input, shape index: {}]   ;;  %s5230_s15 = inlined_call_operand.vmem [shape: f32[2,2,1,128], index: 15, kind: input, shape index: {}]   ;;  %s5231_s16 = inlined_call_operand.vmem [shape: bf16[2,2,128,32], index: 16, kind: input, shape index: {}]   ;;  %s5232_s17 = inlined_call_operand.vmem [shape: f32[2,2,1,32], index: 17, kind: input, shape index: {}]   ;;  %s5233_s18 = inlined_call_operand.vmem [shape: f32[2,2,1,32], index: 18, kind: input, shape index: {}]   ;;  %s5234_s19 = inlined_call_operand.vmem [shape: f32[2,2,1,32], index: 19, kind: input, shape index: {}]   ;;  %s5235_s20 = inlined_call_operand.vmem [shape: f32[2,2,32], index: 20, kind: output, shape index: {}]  }
   0x1   :  { %5246 = sst [smem:[#allocation17_spill]] %s5215_s0  ;;  %s4639_s24 = smov 0  }
   0x2   :  { %5247 = sst [smem:[#allocation18_spill]] %s5216_s1  ;;  %s4633_s1 = smov 0  }
   0x3   :  { %5248 = sst [smem:[#allocation19_spill]] %s5217_s2  ;;  %s4641_s2 = smov 0  }
   0x4   :  { %5249 = sst [smem:[#allocation20_spill]] %s5218_s3 }
   0x5   :  { %5250 = sst [smem:[#allocation21_spill]] %s5219_s4 }
   0x6   :  { %5251 = sst [smem:[#allocation22_spill]] %s5220_s5 }
   0x7   :  { %5252 = sst [smem:[#allocation23_spill]] %s5221_s6 }
   0x8   :  { %5253 = sst [smem:[#allocation24_spill]] %s5222_s7 }
   0x9   :  { %5254 = sst [smem:[#allocation25_spill]] %s5223_s8 }
   0xa   :  { %5255 = sst [smem:[#allocation26_spill]] %s5224_s9 }
   0xb   :  { %5256 = sst [smem:[#allocation27_spill]] %s5225_s10 }
   0xc   :  { %5257 = sst [smem:[#allocation28_spill]] %s5227_s12 }
   0xd   :  { %5258 = sst [smem:[#allocation29_spill]] %s5228_s13 }
   0xe   :  { %5259 = sst [smem:[#allocation30_spill]] %s5229_s14 }
   0xf   :  { %5260 = sst [smem:[#allocation31_spill]] %s5230_s15 }
  0x10   :  { %5261 = sst [smem:[#allocation32_spill]] %s5231_s16 }
  0x11   :  { %5262 = sst [smem:[#allocation33_spill]] %s5232_s17 }
  0x12   :  { %5263 = sst [smem:[#allocation34_spill]] %s5233_s18 }
  0x13   :  { %5264 = sst [smem:[#allocation35_spill]] %s5234_s19 }
  0x14   :  { %5265 = sst [smem:[#allocation36_spill]] %s5235_s20 }
  0x15 LB: > { %5266 = sst [smem:[#allocation4_spill]] %s4513_s23  ;;  %s39_s25 = sadd.s32 1, %s4513_s23  ;;  %s4521_s2 = sphi %s4641_s2, %s30_s2   ;;  %s4517_s24 = sphi %s4639_s24, %s5324_s24   ;;  %s4513_s23 = sphi %s4637_s23, %s5323_s23   ;;  %s4509_s22 = sphi %s4635_s22, %s5322_s22   ;;  %s4505_s1 = sphi %s4633_s1, %s5321_s1  }
  0x16   : > { %5267 = sst [smem:[#allocation5_spill]] %s4517_s24  ;;  %s42_s3 = sadd.s32 1, %s4517_s24 }
  0x17   : > { %5268 = sst [smem:[#allocation6_spill]] %s4521_s2  ;;  %p40_p0 = scmp.ge.s32.totalorder %s39_s25, 2 }
  0x18   : > { %p3706_p1 = scmp.ge.s32.totalorder %s4521_s2, 1  ;;  %p850_p2 = scmp.lt.s32.totalorder %s4521_s2, 5 }
  0x19   : > { %s5326_s25 = smov (%p40_p0, %s39_s25), 0  ;;  %s5328_s3 = smov (!%p40_p0, %s42_s3), %s4517_s24 }
  0x1a   : > { %5269 = sst [smem:[#allocation7_spill]] %s5326_s25  ;;  %p851_p3 = pnand %p3706_p1, %p850_p2 }
  0x1b   : > { %p44_p4 = scmp.ge.s32.totalorder %s5328_s3, 2 }
  0x1c   : > { %854 = sbr.rel (%p851_p3) target bundleno = 3695 (0xe6f), region = 100 }
  0x1d   : > { %s5330_s3 = smov (%p44_p4, %s5328_s3), 0 }
  0x1e   : > { %5270 = sst [smem:[#allocation8_spill]] %s5330_s3 }
  0x21   : > { %p1049_p5 = scmp.lt.s32.totalorder %s4509_s22, 1  ;;  %s3712_s26 = sshll.u32 %s4505_s1, 2 }
  0x22   : > { %p1069_p6 = scmp.lt.s32.totalorder %s3712_s26, 7  ;;  %p1138_p7 = scmp.lt.s32.totalorder %s4505_s1, 1 }
  0x23   : > { %s5332_s22 = smov (!%p1049_p5, %s4509_s22), 1  ;;  %s5271_s30 = sld [smem:[#allocation17_spill]] }
  0x24   : > { %s5334_s26 = smov (!%p1069_p6, %s3712_s26), 7  ;;  %s4257_s27 = sshll.u32 %s5332_s22, 6 }
  0x25   : > { %s4671_s28 = sshll.u32 %s5332_s22, 3  ;;  %s4258_s23 = sshll.u32 %s5332_s22, 9 }
  0x26   : > { %s5275_s15 = sld [smem:[#allocation19_spill]]  ;;  %s3713_s4 = sshll.u32 %s5334_s26, 2 }
  0x27   : > { %s1083_s29 = sadd.s32 %s4671_s28, %s5334_s26  ;;  %s5276_s5 = sld [smem:[#allocation22_spill]] }
  0x28   : > { %s5278_s7 = sld [smem:[#allocation24_spill]]  ;;  %p3747_p8 = scmp.ne.s32.totalorder %s4505_s1, 0 }
  0x29   : > { %s4676_s0 = scalar_lea.vmem %s5271_s30, %s4257_s27  ;;  %s3714_s27 = sshll.u32 %s5332_s22, 5 }
  0x2a   : > { %5272 = sst [smem:[#allocation9_spill]] %s4676_s0  ;;  %s1073_s30 = sadd.s32 %s3714_s27, %s3713_s4 }
  0x2b   : > { %s3715_s21 = sshll.u32 %s1073_s30, 2  ;;  %s5280_s17 = sld [smem:[#allocation21_spill]] }
  0x2c   : > { %s4690_s13 = scalar_lea.vmem %s5275_s15, %s4258_s23  ;;  %s5282_s6 = sld [smem:[#allocation23_spill]] }
  0x2d   : > { %s4697_s25 = scalar_lea.vmem %s5276_s5, %s1083_s29  ;;  %s5283_s8 = sld [smem:[#allocation25_spill]] }
  0x2e   : > { %5277 = sst [smem:[#allocation10_spill]] %s4697_s25  ;;  %s4702_s16 = scalar_lea.vmem %s5278_s7, %s1083_s29 }
  0x2f   : > { %5279 = sst [smem:[#allocation11_spill]] %s4702_s16  ;;  %s3732_s5 = sshll.u32 %s1083_s29, 2 }
  0x30   : > { %s5285_s9 = sld [smem:[#allocation26_spill]]  ;;  %s3733_s7 = sshll.u32 %s5332_s22, 1 }
  0x31   : > { %s4707_s23 = scalar_lea.vmem %s5280_s17, %s3715_s21  ;;  %s5287_s10 = sld [smem:[#allocation27_spill]] }
  0x32   : > { %5281 = sst [smem:[#allocation12_spill]] %s4707_s23  ;;  %s4712_s4 = scalar_lea.vmem %s5282_s6, %s3715_s21 }
  0x33   : > { %s4717_s30 = scalar_lea.vmem %s5283_s8, %s3715_s21  ;;  %s5289_s20 = sld [smem:[#allocation36_spill]] }
  0x34   : > { %5284 = sst [smem:[#allocation13_spill]] %s4717_s30 }
  0x35   : > { %s1139_s21 = scalar_select %p1138_p7, %s4505_s1, 1 }
  0x36   : > { %s4722_s19 = scalar_lea.vmem %s5285_s9, %s1083_s29  ;;  %s5294_s16 = sld [smem:[#allocation30_spill]] }
  0x37   : > { %5286 = sst [smem:[#allocation14_spill]] %s4722_s19  ;;  %s4728_s17 = scalar_lea.vmem %s5287_s10, %s3732_s5 }
  0x38   : > { %5288 = sst [smem:[#allocation15_spill]] %s4728_s17  ;;  %s4738_s0 = sadd.s32 %s3733_s7, %s1139_s21 }
  0x39   : > { %s4733_s6 = scalar_lea.vmem %s5289_s20, %s3733_s7  ;;  %s3736_s18 = sshll.u32 %s1139_s21, 2 }
  0x3a   : > { %5290 = sst [smem:[#allocation16_spill]] %s4733_s6  ;;  %s1163_s9 = sadd.s32 %s3736_s18, %s4671_s28 }
  0x3b   : > { %s3738_s10 = sshll.u32 %s1163_s9, 2  ;;  %s5293_s17 = sld [smem:[#allocation31_spill]] }
  0x3c   : > { %s4760_s23 = scalar_lea.vmem %s5294_s16, %s3738_s10  ;;  %s3740_s29 = sshll.u32 %s1139_s21, 4 }
  0x3d   : > { %s1179_s5 = sadd.s32 %s3740_s29, %s3714_s27  ;;  %s5295_s14 = sld [smem:[#allocation33_spill]] }
  0x3e   : > { %s3742_s12 = sshll.u32 %s1179_s5, 2  ;;  %s5296_s18 = sld [smem:[#allocation34_spill]] }
  0x3f   : > { %s5297_s6 = sld [smem:[#allocation32_spill]] }
  0x40   : > { %s5298_s10 = sld [smem:[#allocation35_spill]] }
  0x41   : > { %s1172_s19 = scalar_lea.vmem %s5293_s17, %s4738_s0  ;;  %s5299_s8 = sld [smem:[#allocation9_spill]] (!%p3747_p8) }
  0x42   : > { %1212 = sbr.rel (%p3747_p8) target bundleno = 401 (0x191), region = 104  ;;  %s5300_s27 = sld [smem:[#allocation20_spill]] (!%p3747_p8) }
  0x43   : > { %s1188_s15 = scalar_lea.vmem %s5295_s14, %s4738_s0  ;;  %s5302_s3 = sld [smem:[#allocation18_spill]] (!%p3747_p8) }
  0x44   : > { %s1195_s9 = scalar_lea.vmem %s5296_s18, %s4738_s0 }
  0x45   : > { %s4773_s20 = scalar_lea.vmem %s5297_s6, %s3742_s12 }
  0x46   : > { %s1202_s16 = scalar_lea.vmem %s5298_s10, %s4738_s0 }
  0x47   : > { %v4523_v0 = vmov 1065369472   ;;  %v3758_v1 = vld [vmem:[%s5299_s8 + $0x8] sm:$0xf]  ;;  %v4260_v3 = vld [vmem:[%s5299_s8 + $0xc] sm:$0xf] }
  0x48   : > { %1261 = vmatpush.bf16.msra.mxu0 %v4523_v0  ;;  %1275 = vmatpush.bf16.msra.mxu1 %v4523_v0  ;;  %v4264_v2 = vld [vmem:[%s5299_s8 + $0x24] sm:$0xf0]  ;;  %v3760_v4 = vld [vmem:[%s5299_s8 + $0x28] sm:$0xf0]  ;;  %v3750_v5 = vld [vmem:[%s5299_s8] sm:$0xf]  ;;  %s5301_s30 = scalar_lea.vmem %s5300_s27, %s5332_s22 }
  0x49   : > { %1289 = vmatpush.bf16.msra.mxu2 %v4523_v0  ;;  %1303 = vmatpush.bf16.msra.mxu3 %v4523_v0  ;;  %v4263_v6 = vld [vmem:[%s5299_s8 + $0x1c] sm:$0xf0]  ;;  %v4259_v7 = vld [vmem:[%s5299_s8 + $0x4] sm:$0xf]  ;;  %v4818_v9 = vor.u32 %v4264_v2, %v3758_v1  ;;  %v4820_v10 = vor.u32 %v4260_v3, %v3760_v4  ;;  %v3766_v13 = vld [vmem:[%s5299_s8 + $0x10] sm:$0xf]  ;;  %s5303_s29 = scalar_lea.vmem %s5302_s3, %s4671_s28 }
  0x4a   : > { %v3752_v8 = vld [vmem:[%s5299_s8 + $0x20] sm:$0xf0]  ;;  %v4824_v11 = vor.u32 %v4263_v6, %v3750_v5  ;;  %v4265_v14 = vld [vmem:[%s5299_s8 + $0x2c] sm:$0xf0]  ;;  %v4261_v15 = vld [vmem:[%s5299_s8 + $0x14] sm:$0xf] }
  0x4b   : > { %v4826_v12 = vor.u32 %v4259_v7, %v3752_v8  ;;  %v3768_v16 = vld [vmem:[%s5299_s8 + $0x30] sm:$0xf0]  ;;  %v3774_v17 = vld [vmem:[%s5299_s8 + $0x18] sm:$0xf]  ;;  %v4262_v19 = vld [vmem:[%s5299_s8 + $0x1c] sm:$0xf]  ;;  %v4870_v23 = vor.u32 %v4265_v14, %v3766_v13 }
  0x4c   : > { %1262 = vmatpush.bf16.msra.mxu0 %v4523_v0  ;;  %1276 = vmatpush.bf16.msra.mxu1 %v4523_v0  ;;  %v4266_v18 = vld [vmem:[%s5299_s8 + $0x34] sm:$0xf0]  ;;  %v3776_v20 = vld [vmem:[%s5299_s8 + $0x38] sm:$0xf0]  ;;  %v4872_v24 = vor.u32 %v4261_v15, %v3768_v16  ;;  %v4289_v29 = vld [vmem:[%s4690_s13 + $0xb0] sm:$0xff]  ;;  %vm2025_vm2 = vcmask 261120  }
  0x4d   : > { %1290 = vmatpush.bf16.msra.mxu2 %v4523_v0  ;;  %1304 = vmatpush.bf16.msra.mxu3 %v4523_v0  ;;  %v4290_v21 = vld [vmem:[%s4690_s13 + $0xb8] sm:$0xff]  ;;  %v4876_v25 = vor.u32 %v4266_v18, %v3774_v17  ;;  %v4878_v26 = vor.u32 %v4262_v19, %v3776_v20  ;;  %v4273_v30 = vld [vmem:[%s4690_s13 + $0x30] sm:$0xff]  ;;  %v4288_v33 = vld [vmem:[%s4690_s13 + $0xa8] sm:$0xff]  ;;  %vm1389_vm3 = vcmask 1041409   ;;  %vm1392_vm4 = vcmask 58368  }
  0x4e   : > { %v4274_v22 = vld [vmem:[%s4690_s13 + $0x38] sm:$0xff]  ;;  %v4297_v31 = vld [vmem:[%s4690_s13 + $0xf0] sm:$0xff]  ;;  %v4272_v34 = vld [vmem:[%s4690_s13 + $0x28] sm:$0xff] }
  0x4f   : > { %v4298_v27 = vld [vmem:[%s4690_s13 + $0xf8] sm:$0xff]  ;;  %v4281_v32 = vld [vmem:[%s4690_s13 + $0x70] sm:$0xff]  ;;  %v4296_v35 = vld [vmem:[%s4690_s13 + $0xe8] sm:$0xff] }
  0x50   : > { %1263 = vmatpush.bf16.msra.mxu0 %v4523_v0  ;;  %1277 = vmatpush.bf16.msra.mxu1 %v4523_v0  ;;  %v4282_v28 = vld [vmem:[%s4690_s13 + $0x78] sm:$0xff]  ;;  %v4280_v36 = vld [vmem:[%s4690_s13 + $0x68] sm:$0xff]  ;;  %v4287_v37 = vld [vmem:[%s4690_s13 + $0xa0] sm:$0xff] }
  0x51   : > { %1291 = vmatpush.bf16.msra.mxu2 %v4523_v0  ;;  %1305 = vmatpush.bf16.msra.mxu3 %v4523_v0  ;;  %v4271_v38 = vld [vmem:[%s4690_s13 + $0x20] sm:$0xff]  ;;  %v4286_v41 = vld [vmem:[%s4690_s13 + $0x98] sm:$0xff]  ;;  %v4285_v45 = vld [vmem:[%s4690_s13 + $0x90] sm:$0xff] }
  0x52   : > { %v4295_v39 = vld [vmem:[%s4690_s13 + $0xe0] sm:$0xff]  ;;  %v4270_v42 = vld [vmem:[%s4690_s13 + $0x18] sm:$0xff]  ;;  %v4269_v46 = vld [vmem:[%s4690_s13 + $0x10] sm:$0xff] }
  0x53   : > { %v4279_v40 = vld [vmem:[%s4690_s13 + $0x60] sm:$0xff]  ;;  %v4294_v43 = vld [vmem:[%s4690_s13 + $0xd8] sm:$0xff]  ;;  %v4293_v47 = vld [vmem:[%s4690_s13 + $0xd0] sm:$0xff] }
  0x54   : > { %1264 = vmatpush.bf16.msra.mxu0 %v4523_v0  ;;  %1278 = vmatpush.bf16.msra.mxu1 %v4523_v0  ;;  %v4278_v44 = vld [vmem:[%s4690_s13 + $0x58] sm:$0xff]  ;;  %v4277_v48 = vld [vmem:[%s4690_s13 + $0x50] sm:$0xff]  ;;  %v4284_v49 = vld [vmem:[%s4690_s13 + $0x88] sm:$0xff] }
  0x55   : > { %1292 = vmatpush.bf16.msra.mxu2 %v4523_v0  ;;  %1306 = vmatpush.bf16.msra.mxu3 %v4523_v0  ;;  %v4268_v50 = vld [vmem:[%s4690_s13 + $0x8] sm:$0xff]  ;;  %v4283_v53 = vld [vmem:[%s4690_s13 + $0x80] sm:$0xff]  ;;  %v4322_v55 = vld [vmem:[%s4690_s13 + $0x1b8] sm:$0xff] }
  0x56   : > { %v4292_v51 = vld [vmem:[%s4690_s13 + $0xc8] sm:$0xff]  ;;  %v4267_v54 = vld [vmem:[%s4690_s13] sm:$0xff]  ;;  %v4306_v56 = vld [vmem:[%s4690_s13 + $0x138] sm:$0xff] }
  0x57   : > { %v4276_v52 = vld [vmem:[%s4690_s13 + $0x48] sm:$0xff]  ;;  %v4291_v57 = vld [vmem:[%s4690_s13 + $0xc0] sm:$0xff]  ;;  %v4330_v59 = vld [vmem:[%s4690_s13 + $0x1f8] sm:$0xff] }
  0x58   : > { %1265 = vmatpush.bf16.msra.mxu0 %v4523_v0  ;;  %1279 = vmatpush.bf16.msra.mxu1 %v4523_v0  ;;  %v4275_v58 = vld [vmem:[%s4690_s13 + $0x40] sm:$0xff]  ;;  %v4314_v60 = vld [vmem:[%s4690_s13 + $0x178] sm:$0xff]  ;;  %v4321_v61 = vld [vmem:[%s4690_s13 + $0x1b0] sm:$0xff] }
  0x59   : > { %1293 = vmatpush.bf16.msra.mxu2 %v4523_v0  ;;  %1307 = vmatpush.bf16.msra.mxu3 %v4523_v0  ;;  %v4305_v62 = vld [vmem:[%s4690_s13 + $0x130] sm:$0xff]  ;;  %v4320_v1 = vld [vmem:[%s4690_s13 + $0x1a8] sm:$0xff]  ;;  %v4319_v5 = vld [vmem:[%s4690_s13 + $0x1a0] sm:$0xff] }
  0x5a   : > { %v4329_v63 = vld [vmem:[%s4690_s13 + $0x1f0] sm:$0xff]  ;;  %v4304_v2 = vld [vmem:[%s4690_s13 + $0x128] sm:$0xff]  ;;  %v4303_v6 = vld [vmem:[%s4690_s13 + $0x120] sm:$0xff] }
  0x5b   : > { %v4328_v3 = vld [vmem:[%s4690_s13 + $0x1e8] sm:$0xff]  ;;  %v4327_v7 = vld [vmem:[%s4690_s13 + $0x1e0] sm:$0xff]  ;;  %v4317_v13 = vld [vmem:[%s4690_s13 + $0x190] sm:$0xff] }
  0x5c   : > { %1266 = vmatpush.bf16.msra.mxu0 %v4523_v0  ;;  %1280 = vmatpush.bf16.msra.mxu1 %v4523_v0  ;;  %v4312_v4 = vld [vmem:[%s4690_s13 + $0x168] sm:$0xff]  ;;  %v4311_v8 = vld [vmem:[%s4690_s13 + $0x160] sm:$0xff]  ;;  %v4301_v14 = vld [vmem:[%s4690_s13 + $0x110] sm:$0xff] }
  0x5d   : > { %1294 = vmatpush.bf16.msra.mxu2 %v4523_v0  ;;  %1308 = vmatpush.bf16.msra.mxu3 %v4523_v0  ;;  %v4325_v15 = vld [vmem:[%s4690_s13 + $0x1d0] sm:$0xff]  ;;  %v4316_v17 = vld [vmem:[%s4690_s13 + $0x188] sm:$0xff] }
  0x5e   : > { %v4309_v16 = vld [vmem:[%s4690_s13 + $0x150] sm:$0xff]  ;;  %v4300_v18 = vld [vmem:[%s4690_s13 + $0x108] sm:$0xff] }
  0x5f   : > { %v4324_v19 = vld [vmem:[%s4690_s13 + $0x1c8] sm:$0xff] }
  0x60   : > { %1267 = vmatpush.bf16.msra.mxu0 %v4523_v0  ;;  %1281 = vmatpush.bf16.msra.mxu1 %v4523_v0  ;;  %v4308_v20 = vld [vmem:[%s4690_s13 + $0x148] sm:$0xff] }
  0x61   : > { %1295 = vmatpush.bf16.msra.mxu2 %v4523_v0  ;;  %1309 = vmatpush.bf16.msra.mxu3 %v4523_v0 }
  0x64   : > { %1268 = vmatpush.bf16.msra.mxu0 %v4523_v0  ;;  %1282 = vmatpush.bf16.msra.mxu1 %v4523_v0 }
  0x65   : > { %1296 = vmatpush.bf16.msra.mxu2 %v4523_v0  ;;  %1310 = vmatpush.bf16.msra.mxu3 %v4523_v0 }
  0x67   : > { %1269 = vmatmul.bf16.vlgmr.msra.gmra.mxu0 %v4824_v11  ;;  %1283 = vmatmul.bf16.vlgmr.msra.gmra.mxu1 %v4826_v12 }
  0x68   : > { %1317 = vmatpush.bf16.msrb.mxu0 %v4523_v0  ;;  %1331 = vmatpush.bf16.msrb.mxu1 %v4523_v0 }
  0x69   : > { %1345 = vmatpush.bf16.msrb.mxu2 %v4523_v0  ;;  %1359 = vmatpush.bf16.msrb.mxu3 %v4523_v0 }
  0x6a   : > { %1297 = vmatmul.bf16.vlgmr.msra.gmra.mxu2 %v4818_v9  ;;  %1311 = vmatmul.bf16.vlgmr.msra.gmra.mxu3 %v4820_v10 }
  0x6c   : > { %1318 = vmatpush.bf16.msrb.mxu0 %v4523_v0  ;;  %1332 = vmatpush.bf16.msrb.mxu1 %v4523_v0 }
  0x6d   : > { %1346 = vmatpush.bf16.msrb.mxu2 %v4523_v0  ;;  %1360 = vmatpush.bf16.msrb.mxu3 %v4523_v0 }
  0x70   : > { %1319 = vmatpush.bf16.msrb.mxu0 %v4523_v0  ;;  %1333 = vmatpush.bf16.msrb.mxu1 %v4523_v0 }
  0x71   : > { %1347 = vmatpush.bf16.msrb.mxu2 %v4523_v0  ;;  %1361 = vmatpush.bf16.msrb.mxu3 %v4523_v0 }
  0x74   : > { %1320 = vmatpush.bf16.msrb.mxu0 %v4523_v0  ;;  %1334 = vmatpush.bf16.msrb.mxu1 %v4523_v0 }
  0x75   : > { %1348 = vmatpush.bf16.msrb.mxu2 %v4523_v0  ;;  %1362 = vmatpush.bf16.msrb.mxu3 %v4523_v0 }
  0x78   : > { %1321 = vmatpush.bf16.msrb.mxu0 %v4523_v0  ;;  %1335 = vmatpush.bf16.msrb.mxu1 %v4523_v0 }
  0x79   : > { %1349 = vmatpush.bf16.msrb.mxu2 %v4523_v0  ;;  %1363 = vmatpush.bf16.msrb.mxu3 %v4523_v0 }
  0x7c   : > { %1322 = vmatpush.bf16.msrb.mxu0 %v4523_v0  ;;  %1336 = vmatpush.bf16.msrb.mxu1 %v4523_v0 }
  0x7d   : > { %1350 = vmatpush.bf16.msrb.mxu2 %v4523_v0  ;;  %1364 = vmatpush.bf16.msrb.mxu3 %v4523_v0 }
  0x80   : > { %1323 = vmatpush.bf16.msrb.mxu0 %v4523_v0  ;;  %1337 = vmatpush.bf16.msrb.mxu1 %v4523_v0 }
  0x81   : > { %1351 = vmatpush.bf16.msrb.mxu2 %v4523_v0  ;;  %1365 = vmatpush.bf16.msrb.mxu3 %v4523_v0 }
  0x84   : > { %1324 = vmatpush.bf16.msrb.mxu0 %v4523_v0  ;;  %1338 = vmatpush.bf16.msrb.mxu1 %v4523_v0 }
  0x85   : > { %1352 = vmatpush.bf16.msrb.mxu2 %v4523_v0  ;;  %1366 = vmatpush.bf16.msrb.mxu3 %v4523_v0  ;;  %v4313_v0 = vld [vmem:[%s4690_s13 + $0x170] sm:$0xff] }
  0x87   : > { %1325 = vmatmul.bf16.vlgmr.msrb.gmra.mxu0 %v4870_v23  ;;  %1339 = vmatmul.bf16.vlgmr.msrb.gmra.mxu1 %v4872_v24 }
  0x88   : > { %1910 = vmatpush.bf16.msra.mxu0 %v4274_v22  ;;  %1353 = vmatmul.bf16.vlgmr.msrb.gmra.mxu2 %v4876_v25  ;;  %v4299_v22 = vld [vmem:[%s4690_s13 + $0x100] sm:$0xff] }
  0x89   : > { %1938 = vmatpush.bf16.msra.mxu2 %v4290_v21  ;;  %1367 = vmatmul.bf16.vlgmr.msrb.gmra.mxu3 %v4878_v26  ;;  %v4315_v21 = vld [vmem:[%s4690_s13 + $0x180] sm:$0xff] }
  0x8a   : > { %1952 = vmatpush.bf16.msra.mxu3 %v4298_v27  ;;  %1924 = vmatpush.bf16.msra.mxu1 %v4282_v28  ;;  %v4323_v27 = vld [vmem:[%s4690_s13 + $0x1c0] sm:$0xff] }
  0x8b   : > { %v4307_v28 = vld [vmem:[%s4690_s13 + $0x140] sm:$0xff] }
  0x8c   : > { %1911 = vmatpush.bf16.msra.mxu0 %v4273_v30 }
  0x8d   : > { %1939 = vmatpush.bf16.msra.mxu2 %v4289_v29  ;;  %v4524_v29 = vmov 0  }
  0x8e   : > { %1953 = vmatpush.bf16.msra.mxu3 %v4297_v31  ;;  %1925 = vmatpush.bf16.msra.mxu1 %v4281_v32 }
  0x8f   : > { %4410 = vset.pattern.permute.xlu0 %v4524_v29 }
  0x90   : > { %1912 = vmatpush.bf16.msra.mxu0 %v4272_v34 }
  0x91   : > { %1940 = vmatpush.bf16.msra.mxu2 %v4288_v33 }
  0x92   : > { %1954 = vmatpush.bf16.msra.mxu3 %v4296_v35  ;;  %1926 = vmatpush.bf16.msra.mxu1 %v4280_v36 }
  0x94   : > { %1913 = vmatpush.bf16.msra.mxu0 %v4271_v38 }
  0x95   : > { %1941 = vmatpush.bf16.msra.mxu2 %v4287_v37 }
  0x96   : > { %1955 = vmatpush.bf16.msra.mxu3 %v4295_v39  ;;  %1927 = vmatpush.bf16.msra.mxu1 %v4279_v40 }
  0x98   : > { %1914 = vmatpush.bf16.msra.mxu0 %v4270_v42 }
  0x99   : > { %1942 = vmatpush.bf16.msra.mxu2 %v4286_v41 }
  0x9a   : > { %1956 = vmatpush.bf16.msra.mxu3 %v4294_v43  ;;  %1928 = vmatpush.bf16.msra.mxu1 %v4278_v44 }
  0x9c   : > { %1915 = vmatpush.bf16.msra.mxu0 %v4269_v46 }
  0x9d   : > { %1943 = vmatpush.bf16.msra.mxu2 %v4285_v45 }
  0x9e   : > { %1957 = vmatpush.bf16.msra.mxu3 %v4293_v47  ;;  %1929 = vmatpush.bf16.msra.mxu1 %v4277_v48 }
  0xa0   : > { %1916 = vmatpush.bf16.msra.mxu0 %v4268_v50 }
  0xa1   : > { %1944 = vmatpush.bf16.msra.mxu2 %v4284_v49 }
  0xa2   : > { %1958 = vmatpush.bf16.msra.mxu3 %v4292_v51  ;;  %1930 = vmatpush.bf16.msra.mxu1 %v4276_v52  ;;  %v4525_v51 = vmov 0.0  }
  0xa4   : > { %1917 = vmatpush.bf16.msra.mxu0 %v4267_v54 }
  0xa5   : > { %1945 = vmatpush.bf16.msra.mxu2 %v4283_v53 }
  0xa6   : > { %1959 = vmatpush.bf16.msra.mxu3 %v4291_v57  ;;  %1931 = vmatpush.bf16.msra.mxu1 %v4275_v58 }
  0xa7   : > { %1918 = vmatmul.bf16.vlgmr.msra.gmra.mxu0 %v4824_v11  ;;  %v4326_v11 = vld [vmem:[%s4690_s13 + $0x1d8] sm:$0xff] }
  0xa8   : > { %1966 = vmatpush.bf16.msrb.mxu0 %v4306_v56  ;;  %1946 = vmatmul.bf16.vlgmr.msra.gmra.mxu2 %v4818_v9  ;;  %v4318_v9 = vld [vmem:[%s4690_s13 + $0x198] sm:$0xff] }
  0xa9   : > { %1994 = vmatpush.bf16.msrb.mxu2 %v4322_v55  ;;  %1960 = vmatmul.bf16.vlgmr.msra.gmra.mxu3 %v4820_v10  ;;  %v4302_v10 = vld [vmem:[%s4690_s13 + $0x118] sm:$0xff] }
  0xaa   : > { %2008 = vmatpush.bf16.msrb.mxu3 %v4330_v59  ;;  %1980 = vmatpush.bf16.msrb.mxu1 %v4314_v60  ;;  %v4411_v60 = vld [vmem:[%s5301_s30] ss:$0 sm:$0xff] }
  0xab   : > { %1932 = vmatmul.bf16.vlgmr.msra.gmra.mxu1 %v4826_v12  ;;  %v4310_v12 = vld [vmem:[%s4690_s13 + $0x158] sm:$0xff] }
  0xac   : > { %1967 = vmatpush.bf16.msrb.mxu0 %v4305_v62 }
  0xad   : > { %1995 = vmatpush.bf16.msrb.mxu2 %v4321_v61 }
  0xae   : > { %2009 = vmatpush.bf16.msrb.mxu3 %v4329_v63  ;;  %1981 = vmatpush.bf16.msrb.mxu1 %v4313_v0 }
  0xb0   : > { %1968 = vmatpush.bf16.msrb.mxu0 %v4304_v2 }
  0xb1   : > { %1996 = vmatpush.bf16.msrb.mxu2 %v4320_v1 }
  0xb2   : > { %2010 = vmatpush.bf16.msrb.mxu3 %v4328_v3  ;;  %1982 = vmatpush.bf16.msrb.mxu1 %v4312_v4 }
  0xb4   : > { %1969 = vmatpush.bf16.msrb.mxu0 %v4303_v6 }
  0xb5   : > { %1997 = vmatpush.bf16.msrb.mxu2 %v4319_v5 }
  0xb6   : > { %2011 = vmatpush.bf16.msrb.mxu3 %v4327_v7  ;;  %1983 = vmatpush.bf16.msrb.mxu1 %v4311_v8 }
  0xb8   : > { %1970 = vmatpush.bf16.msrb.mxu0 %v4302_v10 }
  0xb9   : > { %1998 = vmatpush.bf16.msrb.mxu2 %v4318_v9 }
  0xba   : > { %2012 = vmatpush.bf16.msrb.mxu3 %v4326_v11  ;;  %1984 = vmatpush.bf16.msrb.mxu1 %v4310_v12 }
  0xbc   : > { %1971 = vmatpush.bf16.msrb.mxu0 %v4301_v14 }
  0xbd   : > { %1999 = vmatpush.bf16.msrb.mxu2 %v4317_v13 }
  0xbe   : > { %2013 = vmatpush.bf16.msrb.mxu3 %v4325_v15  ;;  %1985 = vmatpush.bf16.msrb.mxu1 %v4309_v16 }
  0xc0   : > { %1972 = vmatpush.bf16.msrb.mxu0 %v4300_v18 }
  0xc1   : > { %2000 = vmatpush.bf16.msrb.mxu2 %v4316_v17 }
  0xc2   : > { %2014 = vmatpush.bf16.msrb.mxu3 %v4324_v19  ;;  %1986 = vmatpush.bf16.msrb.mxu1 %v4308_v20  ;;  %v2022_v20 = vld [vmem:[%s5303_s29] sm:$0xff] }
  0xc4   : > { %1973 = vmatpush.bf16.msrb.mxu0 %v4299_v22 }
  0xc5   : > { %2001 = vmatpush.bf16.msrb.mxu2 %v4315_v21 }
  0xc6   : > { %2015 = vmatpush.bf16.msrb.mxu3 %v4323_v27  ;;  %1987 = vmatpush.bf16.msrb.mxu1 %v4307_v28 }
  0xc7   : > { %1974 = vmatmul.bf16.vlgmr.msrb.gmra.mxu0 %v4870_v23 }
  0xc8   : > { %2002 = vmatmul.bf16.vlgmr.msrb.gmra.mxu2 %v4876_v25 }
  0xc9   : > { %2016 = vmatmul.bf16.vlgmr.msrb.gmra.mxu3 %v4878_v26  ;;  %1988 = vmatmul.bf16.vlgmr.msrb.gmra.mxu1 %v4872_v24 }
  0xe4   : > { %v1270_v30 = vpop.f32.mrf.mxu0  ;;  %v1284_v31 = vpop.f32.mrf.mxu1 }
  0xe5   : > { %v1285_v34 = vadd.f32 %v1284_v31, %v1270_v30 }
  0xec   : > { %v1272_v35 = vpop.f32.mrf.mxu0  ;;  %v1286_v36 = vpop.f32.mrf.mxu1 }
  0xed   : > { %v1298_v32 = vpop.f32.mrf.mxu2  ;;  %v1312_v33 = vpop.f32.mrf.mxu3  ;;  %v1287_v23 = vadd.f32 %v1286_v36, %v1272_v35  ;;  %v1385_v36 = vlaneseq }
  0xee   : > { %v1299_v37 = vadd.f32 %v1298_v32, %v1285_v34 }
  0xf0   : > { %v1313_v39 = vadd.f32 %v1312_v33, %v1299_v37  ;;  %v1386_v37 = vand.u32 127, %v1385_v36 }
  0xf5   : > { %v1300_v38 = vpop.f32.mrf.mxu2  ;;  %v1314_v25 = vpop.f32.mrf.mxu3 }
  0xf6   : > { %v1301_v42 = vadd.f32 %v1300_v38, %v1287_v23 }
  0xf8   : > { %v1315_v45 = vadd.f32 %v1314_v25, %v1301_v42 }
 0x104   : > { %v1326_v40 = vpop.f32.mrf.mxu0  ;;  %v1340_v41 = vpop.f32.mrf.mxu1 }
 0x105   : > { %v1327_v26 = vadd.f32 %v1326_v40, %v1313_v39 }
 0x107   : > { %v1341_v43 = vadd.f32 %v1340_v41, %v1327_v26 }
 0x10b   : > { %v1354_v24 = vpop.f32.mrf.mxu2 }
 0x10c   : > { %v1368_v44 = vpop.f32.mrf.mxu3  ;;  %v1355_v46 = vadd.f32 %v1354_v24, %v1341_v43  ;;  %v1328_v47 = vpop.f32.mrf.mxu0 }
 0x10d   : > { %v1329_v49 = vadd.f32 %v1328_v47, %v1315_v45  ;;  %v1342_v50 = vpop.f32.mrf.mxu1 }
 0x10e   : > { %v1369_v48 = vadd.f32 %v1368_v44, %v1355_v46 }
 0x10f   : > { %v1343_v53 = vadd.f32 %v1342_v50, %v1329_v49 }
 0x110   : > { %vm1373_vm0 = vcmp.eq.f32.partialorder %v1369_v48, 0.0 }
 0x111   : > { %v1375_v52 = vsel %vm1373_vm0, -1e+09, %v4525_v51 }
 0x112   : > { %1380 = vperm.xlu0 %4410, %v1375_v52  }
 0x113   : > { %v1356_v54 = vpop.f32.mrf.mxu2 }
 0x114   : > { %v1357_v55 = vadd.f32 %v1356_v54, %v1343_v53  ;;  %v1370_v56 = vpop.f32.mrf.mxu3 }
 0x116   : > { %v1371_v57 = vadd.f32 %v1370_v56, %v1357_v55 }
 0x118   : > { %vm1374_vm1 = vcmp.eq.f32.partialorder %v1371_v57, 0.0 }
 0x119   : > { %v1376_v58 = vsel %vm1374_vm1, -1e+09, %v4525_v51 }
 0x11a   : > { %1383 = vperm.xlu0 %4410, %v1376_v58  }
 0x124   : > { %v1919_v59 = vpop.f32.mrf.mxu0 }
 0x125   : > { %v1920_v0 = vadd.f32 %v4411_v60, %v1919_v59 }
 0x128   : > { %v1933_v62 = vpop.f32.mrf.mxu1 }
 0x129   : > { %v1934_v2 = vadd.f32 %v1933_v62, %v1920_v0 }
 0x12b   : > { %v1947_v61 = vpop.f32.mrf.mxu2 }
 0x12c   : > { %v1961_v63 = vpop.f32.mrf.mxu3  ;;  %v1921_v1 = vpop.f32.mrf.mxu0  ;;  %v1948_v4 = vadd.f32 %v1947_v61, %v1934_v2 }
 0x12d   : > { %v1922_v5 = vadd.f32 %v4411_v60, %v1921_v1 }
 0x12e   : > { %v1962_v9 = vadd.f32 %v1961_v63, %v1948_v4 }
 0x130   : > { %v1935_v6 = vpop.f32.mrf.mxu1 }
 0x131   : > { %v1936_v10 = vadd.f32 %v1935_v6, %v1922_v5 }
 0x133   : > { %v1949_v3 = vpop.f32.mrf.mxu2 }
 0x134   : > { %v1963_v7 = vpop.f32.mrf.mxu3  ;;  %v1950_v11 = vadd.f32 %v1949_v3, %v1936_v10 }
 0x136   : > { %v1964_v16 = vadd.f32 %v1963_v7, %v1950_v11 }
 0x144   : > { %v1975_v8 = vpop.f32.mrf.mxu0 }
 0x145   : > { %v1976_v12 = vadd.f32 %v1975_v8, %v1962_v9 }
 0x146   : > { %v1989_v14 = vpop.f32.mrf.mxu1 }
 0x147   : > { %v1990_v17 = vadd.f32 %v1989_v14, %v1976_v12 }
 0x14b   : > { %v2003_v13 = vpop.f32.mrf.mxu2 }
 0x14c   : > { %v2017_v15 = vpop.f32.mrf.mxu3  ;;  %v1977_v18 = vpop.f32.mrf.mxu0  ;;  %v2004_v19 = vadd.f32 %v2003_v13, %v1990_v17 }
 0x14d   : > { %v1978_v22 = vadd.f32 %v1977_v18, %v1964_v16 }
 0x14e   : > { %v2018_v21 = vadd.f32 %v2017_v15, %v2004_v19  ;;  %v1991_v28 = vpop.f32.mrf.mxu1 }
 0x14f   : > { %v1992_v30 = vadd.f32 %v1991_v28, %v1978_v22 }
 0x150   : > { %v2023_v27 = vadd.f32 %v2022_v20, %v2018_v21 }
 0x152   : > { %2026 = vst.msk [vmem:[#allocation2] sm:$0xff] %vm2025_vm2, %v2023_v27 }
 0x153   : > { %v2005_v29 = vpop.f32.mrf.mxu2 }
 0x154   : > { %v2019_v31 = vpop.f32.mrf.mxu3  ;;  %v2006_v32 = vadd.f32 %v2005_v29, %v1992_v30 }
 0x156   : > { %v2020_v33 = vadd.f32 %v2019_v31, %v2006_v32 }
 0x158   : > { %v2024_v34 = vadd.f32 %v2022_v20, %v2020_v33 }
 0x15a   : > { %2027 = vst.msk [vmem:[#allocation2 + $0x8] sm:$0xff] %vm2025_vm2, %v2024_v34 }
 0x184   : > { %v1381_v35 = vpop.permute.xlu0 %1380 }
 0x185   : > { %v1387_v25 = vperm.slane %v1381_v35, %v1386_v37 }
 0x18c   : > { %v1384_v38 = vpop.permute.xlu0 %1383 }
 0x18d   : > { %v1388_v39 = vperm.slane %v1384_v38, %v1386_v37 }
 0x18f   : > { %v1390_v23 = vsel %vm1389_vm3, %v1388_v39, %v1387_v25 }
 0x190   : > { %1393 = vst.msk [vmem:[#allocation3] sm:$0x3] %vm1392_vm4, %v1390_v23 }
 0x191 PF: > { %s5304_s28 = sld [smem:[#allocation12_spill]]  ;;  %v4334_v40 = vld [vmem:[%s4712_s4 + $0x8] sm:$0xff]  ;;  %v4333_v41 = vld [vmem:[%s4712_s4] sm:$0xff]  ;;  %vm2058_vm5 = vcmask 261120   ;;  %vm2148_vm6 = vcmask 64512   ;;  %v4340_v59 = vld [vmem:[%s4712_s4 + $0x18] sm:$0xff]  ;;  %s5310_s7 = scalar_lea.vmem %s5226_s11, %s4738_s0 }
 0x192   : > { %s5305_s5 = sld [smem:[#allocation11_spill]]  ;;  %v4969_v42 = vld [vmem:[#allocation2] sm:$0xff]  ;;  %v4971_v43 = vld [vmem:[#allocation2 + $0x8] sm:$0xff]  ;;  %2102 = vmatpush.bf16.msra.mxu2 %v4334_v40  ;;  %v4339_v63 = vld [vmem:[%s4712_s4 + $0x10] sm:$0xff]  ;;  %vm2216_vm7 = vcmask 1043456   ;;  %p4253_p9 = scmp.ne.s32.totalorder %s4505_s1, 1 }
 0x193   : > { %s5306_s24 = sld [smem:[#allocation10_spill]]  ;;  %v4976_v44 = vpack.c.bf16 %v4971_v43, %v4969_v42 }
 0x194   : > { %s5307_s14 = sld [smem:[#allocation13_spill]] }
 0x195   : > { %s5308_s2 = sld [smem:[#allocation14_spill]] }
 0x196   : > { %2103 = vmatpush.bf16.msra.mxu2 %v4333_v41  ;;  %s5309_s26 = sld [smem:[#allocation15_spill]] }
 0x197   : > { %v4332_v26 = vld [vmem:[%s5304_s28 + $0x8] sm:$0xff]  ;;  %v4331_v24 = vld [vmem:[%s5304_s28] sm:$0xff]  ;;  %v4338_v51 = vld [vmem:[%s5304_s28 + $0x18] sm:$0xff]  ;;  %s5311_s17 = sld [smem:[#allocation28_spill]] }
 0x198   : > { %2068 = vmatpush.bf16.msra.mxu0 %v4332_v26  ;;  %v4413_v45 = vld [vmem:[%s5305_s5] ss:$0 sm:$0xff]  ;;  %v4337_v54 = vld [vmem:[%s5304_s28 + $0x10] sm:$0xff]  ;;  %v4414_v17 = vld [vmem:[%s5305_s5 + $0x1] ss:$0 sm:$0xff]  ;;  %s5313_s12 = sld [smem:[#allocation29_spill]] }
 0x199   : > { %4053 = vmatmul.msk.bf16.vlgmr.msra.gmra.mxu2 %vm2058_vm5, %v4976_v44  ;;  %v4412_v47 = vld [vmem:[%s5306_s24] ss:$0 sm:$0xff]  ;;  %v2031_v1 = vld [vmem:[#allocation3] sm:$0x3]  ;;  %v4415_v15 = vld [vmem:[%s5306_s24 + $0x1] ss:$0 sm:$0xff] }
 0x19a   : > { %v2033_v2 = vrot.slane %v2031_v1, 1  ;;  %v4996_v3 = vperm.slane %v2031_v1, 0  ;;  %v4336_v11 = vld [vmem:[%s5307_s14 + $0x8] sm:$0xff]  ;;  %v4335_v13 = vld [vmem:[%s5307_s14] sm:$0xff]  ;;  %s5319_s1 = sld [smem:[#allocation16_spill]] (!%p4253_p9) }
 0x19b   : > { %2136 = vmatpush.bf16.msrb.mxu2 %v4336_v11  ;;  %v4416_v40 = vld [vmem:[%s5308_s2] ss:$0 sm:$0xff] }
 0x19c   : > { %2069 = vmatpush.bf16.msra.mxu0 %v4331_v24  ;;  %v4998_v4 = vperm.slane %v2033_v2, 0 }
 0x19d   : > { %s5312_s25 = scalar_lea.vmem %s5311_s17, %s4738_s0 }
 0x19e   : > { %s5314_s13 = scalar_lea.vmem %s5313_s12, %s4738_s0 }
 0x19f   : > { %4044 = vmatmul.msk.bf16.vlgmr.msra.gmra.mxu0 %vm2058_vm5, %v4976_v44  ;;  %2137 = vmatpush.bf16.msrb.mxu2 %v4335_v13 }
 0x1a9   : > { %4062 = vmatmul.msk.bf16.vlgmr.msrb.gmra.mxu2 %vm2058_vm5, %v4976_v44 }
 0x21c   : > { %v2105_v46 = vpop.f32.mrf.mxu2  ;;  %v2071_v49 = vpop.f32.mrf.mxu0 }
 0x21d   : > { %v2106_v48 = vadd.f32 %v4413_v45, %v2105_v46  ;;  %v2072_v52 = vadd.f32 %v4412_v47, %v2071_v49 }
 0x21f   : > { %v2146_v50 = vpack.c.bf16 %v2106_v48, %v2106_v48  ;;  %v2144_v56 = vpack.c.bf16 %v2072_v52, %v2072_v52 }
 0x221   : > { %v2153_v53 = vsel %vm2148_vm6, %v2146_v50, 0 }
 0x222   : > { %2162 = vmatpush.bf16.xpose.msra.mxu3 %v2153_v53 }
 0x224   : > { %v2107_v55 = vpop.f32.mrf.mxu2  ;;  %v2073_v60 = vpop.f32.mrf.mxu0 }
 0x225   : > { %v2108_v57 = vadd.f32 %v4413_v45, %v2107_v55  ;;  %v2074_v62 = vadd.f32 %v4412_v47, %v2073_v60 }
 0x227   : > { %v2147_v58 = vpack.c.bf16 %v2108_v57, %v2108_v57  ;;  %v2145_v0 = vpack.c.bf16 %v2074_v62, %v2074_v62 }
 0x229   : > { %4063 = vmatmul.msk.bf16.vlgmr.msra.gmra.mxu3 %vm2148_vm6, %v2144_v56  ;;  %v2172_v61 = vsel %vm2148_vm6, %v2147_v58, 0  ;;  %v4342_v56 = vld [vmem:[%s5307_s14 + $0x18] sm:$0xff]  ;;  %v4341_v58 = vld [vmem:[%s5307_s14 + $0x10] sm:$0xff] }
 0x22a   : > { %2282 = vmatpush.bf16.msrb.mxu3 %v4338_v51  ;;  %2181 = vmatpush.bf16.xpose.msrb.mxu0 %v2172_v61 }
 0x22c   : > { %v2139_v26 = vpop.f32.mrf.mxu2 }
 0x22d   : > { %v2140_v41 = vadd.f32 %v4416_v40, %v2139_v26 }
 0x22e   : > { %2283 = vmatpush.bf16.msrb.mxu3 %v4337_v54 }
 0x22f   : > { %v2211_v24 = vpack.c.bf16 %v2140_v41, %v2140_v41 }
 0x231   : > { %4064 = vmatmul.msk.bf16.vlgmr.msrb.gmra.mxu0 %vm2148_vm6, %v2145_v0  ;;  %v2218_v45 = vsel %vm2216_vm7, %v2211_v24, 0  ;;  %v4346_v24 = vld [vmem:[%s4712_s4 + $0x28] sm:$0xff] }
 0x232   : > { %2318 = vmatpush.bf16.msra.mxu0 %v4340_v59  ;;  %2227 = vmatpush.bf16.msra.mxu1 %v2218_v45  ;;  %v4345_v45 = vld [vmem:[%s4712_s4 + $0x20] sm:$0xff] }
 0x234   : > { %v2141_v47 = vpop.f32.mrf.mxu2 }
 0x235   : > { %v2142_v48 = vadd.f32 %v4416_v40, %v2141_v47  ;;  %v4343_v47 = vld [vmem:[%s5304_s28 + $0x20] sm:$0xff] }
 0x236   : > { %2319 = vmatpush.bf16.msra.mxu0 %v4339_v63  ;;  %2354 = vmatpush.bf16.msrb.mxu1 %v4342_v56 }
 0x237   : > { %v2212_v49 = vpack.c.bf16 %v2142_v48, %v2142_v48 }
 0x239   : > { %4080 = vmatmul.msk.bf16.vlgmr.msrb.gmra.mxu3 %vm2058_vm5, %v4976_v44  ;;  %v2237_v51 = vsel %vm2216_vm7, %v2212_v49, 0 }
 0x23a   : > { %2246 = vmatpush.bf16.msra.mxu2 %v2237_v51  ;;  %2355 = vmatpush.bf16.msrb.mxu1 %v4341_v58 }
 0x241   : > { %4094 = vmatmul.msk.bf16.vlgmr.msra.gmra.mxu0 %vm2058_vm5, %v4976_v44 }
 0x2ac   : > { %v2164_v5 = vpop.f32.mrf.mxu3 }
 0x2ad   : > { %v2165_v6 = vadd.f32 %v2164_v5, %v4996_v3 }
 0x2ae   : > { %v2183_v7 = vpop.f32.mrf.mxu0 }
 0x2af   : > { %v2184_v8 = vadd.f32 %v2183_v7, %v4998_v4  ;;  %v2187_v9 = vsel %vm2148_vm6, %v2165_v6, -inf }
 0x2b0   : > { %2188 = vmax.xlane.f32.xlu1 %v2187_v9 }
 0x2b1   : > { %v2190_v10 = vsel %vm2148_vm6, %v2184_v8, -inf }
 0x2b2   : > { %2191 = vmax.xlane.f32.xlu0 %v2190_v10  ;;  %v2253_v10 = vld [vmem:[%s5309_s26] sm:$0xf] }
 0x2b3   : > { %v2495_v11 = vsel %vm2216_vm7, %v2253_v10, 0 }
 0x2b4   : > { %v2166_v12 = vpop.f32.mrf.mxu3 }
 0x2b6   : > { %v2185_v14 = vpop.f32.mrf.mxu0 }
 0x2bc   : > { %v2285_v16 = vpop.f32.mrf.mxu3 }
 0x2bd   : > { %v5010_v18 = vadd.f32 %v4415_v15, %v2285_v16  ;;  %v4417_v16 = vld [vmem:[%s5308_s2 + $0x1] ss:$0 sm:$0xff] }
 0x2be   : > { %v2321_v19 = vpop.f32.mrf.mxu0 }
 0x2bf   : > { %v2322_v20 = vadd.f32 %v4414_v17, %v2321_v19  ;;  %v2362_v2 = vpack.c.bf16 %v5010_v18, %v5010_v18 }
 0x2c1   : > { %v2364_v46 = vpack.c.bf16 %v2322_v20, %v2322_v20 }
 0x2c3   : > { %v2370_v50 = vsel %vm2148_vm6, %v2364_v46, 0  ;;  %v4344_v46 = vld [vmem:[%s5304_s28 + $0x28] sm:$0xff] }
 0x2c4   : > { %v2287_v27 = vpop.f32.mrf.mxu3  ;;  %2379 = vmatpush.bf16.xpose.msrb.mxu2 %v2370_v50 }
 0x2c5   : > { %v2288_v30 = vadd.f32 %v4415_v15, %v2287_v27 }
 0x2c6   : > { %v2323_v21 = vpop.f32.mrf.mxu0 }
 0x2c7   : > { %v2324_v22 = vadd.f32 %v4414_v17, %v2323_v21  ;;  %v2363_v31 = vpack.c.bf16 %v2288_v30, %v2288_v30 }
 0x2c9   : > { %v2365_v28 = vpack.c.bf16 %v2324_v22, %v2324_v22 }
 0x2cb   : > { %v2389_v29 = vsel %vm2148_vm6, %v2365_v28, 0 }
 0x2cc   : > { %2398 = vmatpush.bf16.xpose.msra.mxu3 %v2389_v29 }
 0x2d3   : > { %4110 = vmatmul.msk.bf16.vlgmr.msra.gmra.mxu3 %vm2148_vm6, %v2363_v31 }
 0x2d4   : > { %2504 = vmatpush.bf16.msrb.mxu3 %v2495_v11  ;;  %v4348_v11 = vld [vmem:[%s5307_s14 + $0x28] sm:$0xff] }
 0x323   : > { %v2189_v32 = vpop.xlane.xlu1 %2188 }
 0x324   : > { %v2193_v33 = vsub.f32 %v2165_v6, %v2189_v32 }
 0x325   : > { %v2192_v34 = vpop.xlane.xlu0 %2191 }
 0x326   : > { %v2195_v35 = vmul.f32 1.442695, %v2193_v33  ;;  %v2194_v36 = vsub.f32 %v2184_v8, %v2192_v34 }
 0x328   : > { %4431 = vpow2.f32 %v2195_v35  ;;  %v2197_v37 = vmul.f32 1.442695, %v2194_v36 }
 0x32a   : > { %4433 = vpow2.f32 %v2197_v37 }
 0x32e   : > { %v4432_v38 = vpop.eup %4431 }
 0x32f   : > { %v2199_v25 = vsel %vm2148_vm6, %v4432_v38, 0.0 }
 0x330   : > { %v4434_v39 = vpop.eup %4433  ;;  %2200 = vadd.xlane.f32.xlu1 %v2199_v25 }
 0x331   : > { %v2202_v23 = vsel %vm2148_vm6, %v4434_v39, 0.0 }
 0x332   : > { %2203 = vadd.xlane.f32.xlu0 %v2202_v23 }
 0x356   : > { %v2400_v52 = vpop.f32.mrf.mxu3 }
 0x357   : > { %v2401_v53 = vadd.f32 %v2400_v52, %v4998_v4  ;;  %v4113_v52 = vld [vmem:[%s5309_s26 + $0x4] sm:$0xf] }
 0x359   : > { %v2407_v54 = vsel %vm2148_vm6, %v2401_v53, -inf }
 0x35a   : > { %2408 = vmax.xlane.f32.xlu2 %v2407_v54 }
 0x35e   : > { %v2402_v55 = vpop.f32.mrf.mxu3 }
 0x35f   : > { %v4418_v55 = vld [vmem:[%s5305_s5 + $0x2] ss:$0 sm:$0xff] }
 0x3a3   : > { %v2201_v57 = vpop.xlane.xlu1 %2200 }
 0x3a4   : > { %4435 = vrcp.f32 %v2201_v57 }
 0x3a5   : > { %v2204_v59 = vpop.xlane.xlu0 %2203 }
 0x3a6   : > { %4437 = vrcp.f32 %v2204_v59 }
 0x3aa   : > { %v4436_v60 = vpop.eup %4435 }
 0x3ab   : > { %v2207_v61 = vmul.f32 %v4436_v60, %v4432_v38 }
 0x3ac   : > { %v4438_v62 = vpop.eup %4437 }
 0x3ad   : > { %v2208_v63 = vmul.f32 %v4438_v62, %v4434_v39  ;;  %v2209_v0 = vpack.c.bf16 %v2207_v61, %v2207_v61 }
 0x3af   : > { %v2210_v1 = vpack.c.bf16 %v2208_v63, %v2208_v63  ;;  %4065 = vmatmul.msk.bf16.vlgmr.msra.gmra.mxu1 %vm2148_vm6, %v2209_v0 }
 0x3b1   : > { %4066 = vmatmul.msk.bf16.vlgmr.msra.gmra.mxu2 %vm2148_vm6, %v2210_v1 }
 0x3bf   : > { %4108 = vmatmul.msk.bf16.vlgmr.msrb.gmra.mxu1 %vm2058_vm5, %v4976_v44 }
 0x3c1   : > { %4109 = vmatmul.msk.bf16.vlgmr.msrb.gmra.mxu2 %vm2148_vm6, %v2362_v2  ;;  %v4419_v2 = vld [vmem:[%s5306_s24 + $0x2] ss:$0 sm:$0xff] }
 0x3cd   : > { %v2409_v5 = vpop.xlane.xlu2 %2408 }
 0x3ce   : > { %v2411_v6 = vsub.f32 %v2401_v53, %v2409_v5  ;;  %v2475_v53 = vsel %vm2216_vm7, %v4113_v52, 0 }
 0x3cf   : > { %2484 = vmatpush.bf16.msra.mxu2 %v2475_v53 }
 0x3d0   : > { %v2414_v7 = vmul.f32 1.442695, %v2411_v6 }
 0x3d2   : > { %4439 = vpow2.f32 %v2414_v7 }
 0x3d3   : > { %2611 = vmatpush.bf16.msrb.mxu2 %v4348_v11 }
 0x3d8   : > { %v4440_v8 = vpop.eup %4439 }
 0x3d9   : > { %v2419_v9 = vsel %vm2148_vm6, %v4440_v8, 0.0 }
 0x3da   : > { %2420 = vadd.xlane.f32.xlu0 %v2419_v9 }
 0x42c   : > { %v2229_v12 = vpop.f32.mrf.mxu1 }
 0x434   : > { %v2231_v13 = vpop.f32.mrf.mxu1  ;;  %v2248_v14 = vpop.f32.mrf.mxu2 }
 0x435   : > { %v2252_v15 = vpack.c.bf16 %v2248_v14, %v2229_v12  ;;  %v4347_v12 = vld [vmem:[%s5307_s14 + $0x20] sm:$0xff] }
 0x436   : > { %2612 = vmatpush.bf16.msrb.mxu2 %v4347_v12 }
 0x437   : > { %4115 = vmatmul.msk.bf16.vlgmr.msrb.gmra.mxu3 %vm2148_vm6, %v2252_v15 }
 0x43c   : > { %v2250_v17 = vpop.f32.mrf.mxu2  ;;  %v2357_v18 = vpop.f32.mrf.mxu1 }
 0x43d   : > { %v2358_v19 = vadd.f32 %v4417_v16, %v2357_v18 }
 0x43f   : > { %v2428_v20 = vpack.c.bf16 %v2358_v19, %v2358_v19 }
 0x441   : > { %v2434_v21 = vsel %vm2216_vm7, %v2428_v20, 0 }
 0x442   : > { %2443 = vmatpush.bf16.msrb.mxu0 %v2434_v21 }
 0x444   : > { %v2381_v22 = vpop.f32.mrf.mxu2  ;;  %v2359_v27 = vpop.f32.mrf.mxu1 }
 0x445   : > { %v2382_v28 = vadd.f32 %v2381_v22, %v4996_v3  ;;  %v2360_v29 = vadd.f32 %v4417_v16, %v2359_v27 }
 0x446   : > { %2539 = vmatpush.bf16.msra.mxu0 %v4344_v46 }
 0x447   : > { %v2404_v30 = vsel %vm2148_vm6, %v2382_v28, -inf  ;;  %v2429_v31 = vpack.c.bf16 %v2360_v29, %v2360_v29  ;;  %v4420_v29 = vld [vmem:[%s5308_s2 + $0x2] ss:$0 sm:$0xff] }
 0x448   : > { %2405 = vmax.xlane.f32.xlu2 %v2404_v30 }
 0x449   : > { %v2453_v32 = vsel %vm2216_vm7, %v2429_v31, 0 }
 0x44a   : > { %2462 = vmatpush.bf16.msra.mxu1 %v2453_v32  ;;  %2540 = vmatpush.bf16.msra.mxu0 %v4343_v47  ;;  %v4352_v47 = vld [vmem:[%s4712_s4 + $0x38] sm:$0xff] }
 0x44c   : > { %v2383_v33 = vpop.f32.mrf.mxu2 }
 0x44d   : > { %v2421_v34 = vpop.xlane.xlu0 %2420 }
 0x44e   : > { %4441 = vrcp.f32 %v2421_v34  ;;  %2575 = vmatpush.bf16.msrb.mxu1 %v4346_v24 }
 0x452   : > { %2576 = vmatpush.bf16.msrb.mxu1 %v4345_v45 }
 0x454   : > { %v4442_v35 = vpop.eup %4441 }
 0x455   : > { %v2425_v36 = vmul.f32 %v4442_v35, %v4440_v8 }
 0x457   : > { %v2427_v37 = vpack.c.bf16 %v2425_v36, %v2425_v36 }
 0x459   : > { %4112 = vmatmul.msk.bf16.vlgmr.msra.gmra.mxu1 %vm2148_vm6, %v2427_v37 }
 0x469   : > { %4143 = vmatmul.msk.bf16.vlgmr.msrb.gmra.mxu1 %vm2058_vm5, %v4976_v44 }
 0x4ba   : > { %v5062_v13 = vpop.f32.mrf.mxu3 }
 0x4bb   : > { %v2406_v38 = vpop.xlane.xlu2 %2405 }
 0x4bc   : > { %v2410_v25 = vsub.f32 %v2382_v28, %v2406_v38 }
 0x4be   : > { %v2412_v39 = vmul.f32 1.442695, %v2410_v25 }
 0x4c0   : > { %4443 = vpow2.f32 %v2412_v39 }
 0x4c2   : > { %v5066_v14 = vpop.f32.mrf.mxu3 }
 0x4c6   : > { %v4444_v23 = vpop.eup %4443 }
 0x4c7   : > { %v2416_v40 = vsel %vm2148_vm6, %v4444_v23, 0.0 }
 0x4c8   : > { %2417 = vadd.xlane.f32.xlu1 %v2416_v40 }
 0x4d6   : > { %v2464_v26 = vpop.f32.mrf.mxu1 }
 0x4de   : > { %v2466_v41 = vpop.f32.mrf.mxu1 }
 0x4e6   : > { %v2578_v54 = vpop.f32.mrf.mxu1 }
 0x4e7   : > { %v2579_v56 = vadd.f32 %v4418_v55, %v2578_v54 }
 0x4e9   : > { %v2621_v57 = vpack.c.bf16 %v2579_v56, %v2579_v56 }
 0x4eb   : > { %v2627_v58 = vsel %vm2148_vm6, %v2621_v57, 0 }
 0x4ec   : > { %2636 = vmatpush.bf16.xpose.msra.mxu3 %v2627_v58 }
 0x4ee   : > { %v2580_v59 = vpop.f32.mrf.mxu1 }
 0x4ef   : > { %v2581_v60 = vadd.f32 %v4418_v55, %v2580_v59  ;;  %v4162_v59 = vld [vmem:[%s5309_s26 + $0x8] sm:$0xf] }
 0x4f1   : > { %v2622_v61 = vpack.c.bf16 %v2581_v60, %v2581_v60  ;;  %v2732_v60 = vsel %vm2216_vm7, %v4162_v59, 0 }
 0x4f3   : > { %v2646_v62 = vsel %vm2148_vm6, %v2622_v61, 0 }
 0x4f4   : > { %2741 = vmatpush.bf16.msrb.mxu3 %v2732_v60 }
 0x53b   : > { %v2418_v48 = vpop.xlane.xlu1 %2417 }
 0x53c   : > { %4445 = vrcp.f32 %v2418_v48  ;;  %v4351_v48 = vld [vmem:[%s4712_s4 + $0x30] sm:$0xff] }
 0x542   : > { %v4446_v49 = vpop.eup %4445 }
 0x543   : > { %v2424_v50 = vmul.f32 %v4446_v49, %v4444_v23  ;;  %v4350_v49 = vld [vmem:[%s5304_s28 + $0x38] sm:$0xff] }
 0x545   : > { %v2426_v51 = vpack.c.bf16 %v2424_v50, %v2424_v50  ;;  %v4349_v50 = vld [vmem:[%s5304_s28 + $0x30] sm:$0xff] }
 0x547   : > { %4111 = vmatmul.msk.bf16.vlgmr.msrb.gmra.mxu0 %vm2148_vm6, %v2426_v51 }
 0x548   : > { %2655 = vmatpush.bf16.xpose.msrb.mxu0 %v2646_v62 }
 0x557   : > { %4129 = vmatmul.msk.bf16.vlgmr.msra.gmra.mxu0 %vm2058_vm5, %v4976_v44 }
 0x558   : > { %2778 = vmatpush.bf16.msra.mxu0 %v4350_v49 }
 0x55c   : > { %2779 = vmatpush.bf16.msra.mxu0 %v4349_v50 }
 0x5c4   : > { %v2445_v63 = vpop.f32.mrf.mxu0 }
 0x5c5   : > { %v2468_v0 = vpack.c.bf16 %v2464_v26, %v2445_v63 }
 0x5c7   : > { %4114 = vmatmul.msk.bf16.vlgmr.msra.gmra.mxu2 %vm2148_vm6, %v2468_v0 }
 0x5cc   : > { %v2447_v1 = vpop.f32.mrf.mxu0 }
 0x5cd   : > { %v4421_v1 = vld [vmem:[%s5305_s5 + $0x3] ss:$0 sm:$0xff] }
 0x5d4   : > { %v2542_v5 = vpop.f32.mrf.mxu0 }
 0x5d5   : > { %v2543_v6 = vadd.f32 %v4419_v2, %v2542_v5 }
 0x5d7   : > { %v2619_v7 = vpack.c.bf16 %v2543_v6, %v2543_v6  ;;  %4157 = vmatmul.msk.bf16.vlgmr.msrb.gmra.mxu2 %vm2058_vm5, %v4976_v44 }
 0x5d9   : > { %4158 = vmatmul.msk.bf16.vlgmr.msra.gmra.mxu3 %vm2148_vm6, %v2619_v7  ;;  %v4422_v7 = vld [vmem:[%s5306_s24 + $0x3] ss:$0 sm:$0xff] }
 0x5dc   : > { %v2544_v8 = vpop.f32.mrf.mxu0 }
 0x5dd   : > { %v2545_v9 = vadd.f32 %v4419_v2, %v2544_v8 }
 0x5df   : > { %v2620_v10 = vpack.c.bf16 %v2545_v9, %v2545_v9 }
 0x5e1   : > { %4159 = vmatmul.msk.bf16.vlgmr.msrb.gmra.mxu0 %vm2148_vm6, %v2620_v10 }
 0x5f1   : > { %4177 = vmatmul.msk.bf16.vlgmr.msra.gmra.mxu0 %vm2058_vm5, %v4976_v44 }
 0x64a   : > { %v5072_v27 = vpop.f32.mrf.mxu2 }
 0x652   : > { %v5074_v28 = vpop.f32.mrf.mxu2 }
 0x65a   : > { %v2614_v30 = vpop.f32.mrf.mxu2 }
 0x65b   : > { %v2615_v32 = vadd.f32 %v4420_v29, %v2614_v30  ;;  %v2507_v30 = vadd.f32 %v5062_v13, %v5072_v27 }
 0x65c   : > { %v2638_v15 = vpop.f32.mrf.mxu3 }
 0x65d   : > { %v2639_v16 = vadd.f32 %v2638_v15, %v4996_v3  ;;  %v2685_v35 = vpack.c.bf16 %v2615_v32, %v2615_v32 }
 0x65e   : > { %v2657_v17 = vpop.f32.mrf.mxu0 }
 0x65f   : > { %v2658_v18 = vadd.f32 %v2657_v17, %v4998_v4  ;;  %v2661_v19 = vsel %vm2148_vm6, %v2639_v16, -inf  ;;  %v2691_v38 = vsel %vm2216_vm7, %v2685_v35, 0 }
 0x660   : > { %2662 = vmax.xlane.f32.xlu2 %v2661_v19  ;;  %2700 = vmatpush.bf16.msra.mxu1 %v2691_v38 }
 0x661   : > { %v2664_v20 = vsel %vm2148_vm6, %v2658_v18, -inf }
 0x662   : > { %2665 = vmax.xlane.f32.xlu0 %v2664_v20  ;;  %v2616_v39 = vpop.f32.mrf.mxu2 }
 0x663   : > { %v2617_v23 = vadd.f32 %v4420_v29, %v2616_v39  ;;  %v4353_v29 = vld [vmem:[%s5307_s14 + $0x30] sm:$0xff] }
 0x664   : > { %v2640_v21 = vpop.f32.mrf.mxu3  ;;  %2814 = vmatpush.bf16.msrb.mxu1 %v4352_v47 }
 0x665   : > { %v2686_v40 = vpack.c.bf16 %v2617_v23, %v2617_v23  ;;  %v4423_v23 = vld [vmem:[%s5308_s2 + $0x3] ss:$0 sm:$0xff] }
 0x666   : > { %v2659_v22 = vpop.f32.mrf.mxu0 }
 0x667   : > { %v2710_v24 = vsel %vm2216_vm7, %v2686_v40, 0  ;;  %v4354_v22 = vld [vmem:[%s5307_s14 + $0x38] sm:$0xff] }
 0x668   : > { %2719 = vmatpush.bf16.msra.mxu2 %v2710_v24  ;;  %2815 = vmatpush.bf16.msrb.mxu1 %v4351_v48 }
 0x66c   : > { %2850 = vmatpush.bf16.msrb.mxu2 %v4354_v22 }
 0x66e   : > { %v2781_v8 = vpop.f32.mrf.mxu0 }
 0x66f   : > { %v2782_v11 = vadd.f32 %v4422_v7, %v2781_v8  ;;  %v4424_v8 = vld [vmem:[%s5310_s7] ss:$0 sm:$0xff] }
 0x670   : > { %2851 = vmatpush.bf16.msrb.mxu2 %v4353_v29 }
 0x671   : > { %v2858_v15 = vpack.c.bf16 %v2782_v11, %v2782_v11 }
 0x6d3   : > { %v2663_v31 = vpop.xlane.xlu2 %2662 }
 0x6d4   : > { %v2667_v33 = vsub.f32 %v2639_v16, %v2663_v31 }
 0x6d5   : > { %v2666_v34 = vpop.xlane.xlu0 %2665 }
 0x6d6   : > { %v2669_v36 = vmul.f32 1.442695, %v2667_v33  ;;  %v2668_v37 = vsub.f32 %v2658_v18, %v2666_v34  ;;  %v2783_v18 = vpop.f32.mrf.mxu0  ;;  %v2509_v33 = vadd.f32 %v5066_v14, %v5074_v28 }
 0x6d7   : > { %v2784_v20 = vadd.f32 %v4422_v7, %v2783_v18 }
 0x6d8   : > { %4447 = vpow2.f32 %v2669_v36  ;;  %v2671_v25 = vmul.f32 1.442695, %v2668_v37 }
 0x6d9   : > { %v2859_v21 = vpack.c.bf16 %v2784_v20, %v2784_v20 }
 0x6da   : > { %4449 = vpow2.f32 %v2671_v25 }
 0x6de   : > { %v4448_v26 = vpop.eup %4447 }
 0x6df   : > { %v2673_v41 = vsel %vm2148_vm6, %v4448_v26, 0.0 }
 0x6e0   : > { %v4450_v45 = vpop.eup %4449  ;;  %2674 = vadd.xlane.f32.xlu1 %v2673_v41 }
 0x6e1   : > { %v2676_v46 = vsel %vm2148_vm6, %v4450_v45, 0.0 }
 0x6e2   : > { %2677 = vadd.xlane.f32.xlu2 %v2676_v46 }
 0x753   : > { %v2675_v51 = vpop.xlane.xlu1 %2674 }
 0x754   : > { %4451 = vrcp.f32 %v2675_v51 }
 0x755   : > { %v2678_v52 = vpop.xlane.xlu2 %2677 }
 0x756   : > { %4453 = vrcp.f32 %v2678_v52 }
 0x75a   : > { %v4452_v53 = vpop.eup %4451 }
 0x75b   : > { %v2681_v54 = vmul.f32 %v4452_v53, %v4448_v26 }
 0x75c   : > { %v4454_v55 = vpop.eup %4453 }
 0x75d   : > { %v2683_v56 = vpack.c.bf16 %v2681_v54, %v2681_v54  ;;  %v2682_v57 = vmul.f32 %v4454_v55, %v4450_v45 }
 0x75f   : > { %v2684_v58 = vpack.c.bf16 %v2682_v57, %v2682_v57  ;;  %4160 = vmatmul.msk.bf16.vlgmr.msra.gmra.mxu1 %vm2148_vm6, %v2683_v56 }
 0x761   : > { %4161 = vmatmul.msk.bf16.vlgmr.msra.gmra.mxu2 %vm2148_vm6, %v2684_v58 }
 0x76f   : > { %4191 = vmatmul.msk.bf16.vlgmr.msrb.gmra.mxu1 %vm2058_vm5, %v4976_v44 }
 0x771   : > { %4205 = vmatmul.msk.bf16.vlgmr.msrb.gmra.mxu2 %vm2058_vm5, %v4976_v44 }
 0x7dc   : > { %v2702_v61 = vpop.f32.mrf.mxu1 }
 0x7e4   : > { %v2704_v62 = vpop.f32.mrf.mxu1  ;;  %v2721_v63 = vpop.f32.mrf.mxu2 }
 0x7e5   : > { %v2725_v0 = vpack.c.bf16 %v2721_v63, %v2702_v61  ;;  %v4210_v63 = vld [vmem:[%s5309_s26 + $0xc] sm:$0xf] }
 0x7e7   : > { %4163 = vmatmul.msk.bf16.vlgmr.msrb.gmra.mxu3 %vm2148_vm6, %v2725_v0  ;;  %v2971_v0 = vsel %vm2216_vm7, %v4210_v63, 0 }
 0x7ec   : > { %v2723_v2 = vpop.f32.mrf.mxu2  ;;  %v2817_v5 = vpop.f32.mrf.mxu1 }
 0x7ed   : > { %v2818_v6 = vadd.f32 %v4421_v1, %v2817_v5 }
 0x7ef   : > { %v2860_v9 = vpack.c.bf16 %v2818_v6, %v2818_v6 }
 0x7f1   : > { %v2866_v10 = vsel %vm2148_vm6, %v2860_v9, 0 }
 0x7f2   : > { %2875 = vmatpush.bf16.xpose.msra.mxu3 %v2866_v10 }
 0x7f4   : > { %v2819_v12 = vpop.f32.mrf.mxu1  ;;  %v2853_v40 = vpop.f32.mrf.mxu2 }
 0x7f5   : > { %v2820_v16 = vadd.f32 %v4421_v1, %v2819_v12  ;;  %v2854_v28 = vadd.f32 %v4423_v23, %v2853_v40  ;;  %v4355_v40 = vld [vmem:[%s4760_s23] sm:$0xff] }
 0x7f7   : > { %v2861_v17 = vpack.c.bf16 %v2820_v16, %v2820_v16  ;;  %v2924_v24 = vpack.c.bf16 %v2854_v28, %v2854_v28  ;;  %v4364_v28 = vld [vmem:[%s4773_s20 + $0x38] sm:$0xff] }
 0x7f9   : > { %v2885_v19 = vsel %vm2148_vm6, %v2861_v17, 0  ;;  %4206 = vmatmul.msk.bf16.vlgmr.msra.gmra.mxu3 %vm2148_vm6, %v2858_v15  ;;  %v2930_v46 = vsel %vm2216_vm7, %v2924_v24, 0  ;;  %v4363_v24 = vld [vmem:[%s4773_s20 + $0x30] sm:$0xff] }
 0x7fa   : > { %2894 = vmatpush.bf16.xpose.msrb.mxu0 %v2885_v19  ;;  %2939 = vmatpush.bf16.msra.mxu1 %v2930_v46 }
 0x7fb   : > { %2980 = vmatpush.bf16.msrb.mxu3 %v2971_v0 }
 0x7fc   : > { %v2855_v47 = vpop.f32.mrf.mxu2 }
 0x7fd   : > { %v2856_v48 = vadd.f32 %v4423_v23, %v2855_v47 }
 0x7fe   : > { %3169 = vmatpush.bf16.msrb.mxu1 %v4364_v28 }
 0x7ff   : > { %v2925_v49 = vpack.c.bf16 %v2856_v48, %v2856_v48 }
 0x801   : > { %4207 = vmatmul.msk.bf16.vlgmr.msrb.gmra.mxu0 %vm2148_vm6, %v2859_v21  ;;  %v2949_v52 = vsel %vm2216_vm7, %v2925_v49, 0  ;;  %v4526_v21 = vmov 32.0   ;;  %v4361_v49 = vld [vmem:[%s4773_s20 + $0x20] sm:$0xff] }
 0x802   : > { %2958 = vmatpush.bf16.msra.mxu2 %v2949_v52  ;;  %3170 = vmatpush.bf16.msrb.mxu1 %v4363_v24 }
 0x86a   : > { %v2743_v31 = vpop.f32.mrf.mxu3 }
 0x86b   : > { %v5104_v32 = vadd.f32 %v2743_v31, %v2507_v30 }
 0x872   : > { %v2745_v34 = vpop.f32.mrf.mxu3 }
 0x873   : > { %v5110_v35 = vadd.f32 %v2745_v34, %v2509_v33 }
 0x87c   : > { %v2877_v36 = vpop.f32.mrf.mxu3 }
 0x87d   : > { %v2878_v37 = vadd.f32 %v2877_v36, %v4996_v3 }
 0x87e   : > { %v2896_v38 = vpop.f32.mrf.mxu0 }
 0x87f   : > { %v2897_v13 = vadd.f32 %v2896_v38, %v4998_v4  ;;  %v2900_v27 = vsel %vm2148_vm6, %v2878_v37, -inf }
 0x880   : > { %2901 = vmax.xlane.f32.xlu1 %v2900_v27 }
 0x881   : > { %v2903_v25 = vsel %vm2148_vm6, %v2897_v13, -inf }
 0x882   : > { %2904 = vmax.xlane.f32.xlu0 %v2903_v25 }
 0x884   : > { %v2879_v39 = vpop.f32.mrf.mxu3 }
 0x885   : > { %v4356_v39 = vld [vmem:[%s4760_s23 + $0x8] sm:$0xff] }
 0x886   : > { %v2898_v44 = vpop.f32.mrf.mxu0  ;;  %3090 = vmatpush.bf16.msra.mxu0 %v4356_v39 }
 0x88a   : > { %3091 = vmatpush.bf16.msra.mxu0 %v4355_v40 }
 0x8f3   : > { %v2902_v14 = vpop.xlane.xlu1 %2901 }
 0x8f4   : > { %v2906_v26 = vsub.f32 %v2878_v37, %v2902_v14 }
 0x8f5   : > { %v2905_v41 = vpop.xlane.xlu0 %2904 }
 0x8f6   : > { %v2908_v45 = vmul.f32 1.442695, %v2906_v26  ;;  %v2907_v3 = vsub.f32 %v2897_v13, %v2905_v41 }
 0x8f8   : > { %4455 = vpow2.f32 %v2908_v45  ;;  %v2910_v4 = vmul.f32 1.442695, %v2907_v3 }
 0x8fa   : > { %4457 = vpow2.f32 %v2910_v4  ;;  %v4362_v4 = vld [vmem:[%s4773_s20 + $0x28] sm:$0xff] }
 0x8fb   : > { %3171 = vmatpush.bf16.msrb.mxu1 %v4362_v4 }
 0x8fe   : > { %v4456_v50 = vpop.eup %4455 }
 0x8ff   : > { %v2912_v51 = vsel %vm2148_vm6, %v4456_v50, 0.0  ;;  %3172 = vmatpush.bf16.msrb.mxu1 %v4361_v49 }
 0x900   : > { %v4458_v53 = vpop.eup %4457  ;;  %2913 = vadd.xlane.f32.xlu0 %v2912_v51 }
 0x901   : > { %v2915_v54 = vsel %vm2148_vm6, %v4458_v53, 0.0 }
 0x902   : > { %2916 = vadd.xlane.f32.xlu2 %v2915_v54 }
 0x973   : > { %v2914_v55 = vpop.xlane.xlu0 %2913 }
 0x974   : > { %4459 = vrcp.f32 %v2914_v55 }
 0x975   : > { %v2917_v56 = vpop.xlane.xlu2 %2916 }
 0x976   : > { %4461 = vrcp.f32 %v2917_v56 }
 0x977   : > { %4463 = vrcp.f32 %v4526_v21  ;;  %v4428_v21 = vld [vmem:[%s1188_s15] ss:$0 sm:$0xff] }
 0x97a   : > { %v4460_v57 = vpop.eup %4459 }
 0x97b   : > { %v2920_v58 = vmul.f32 %v4460_v57, %v4456_v50 }
 0x97c   : > { %v4462_v59 = vpop.eup %4461 }
 0x97d   : > { %v2922_v60 = vpack.c.bf16 %v2920_v58, %v2920_v58  ;;  %v2921_v61 = vmul.f32 %v4462_v59, %v4458_v53  ;;  %v4464_v22 = vpop.eup %4463  ;;  %v4425_v58 = vld [vmem:[%s5312_s25] ss:$0 sm:$0xff] }
 0x97e   : > { %v3006_v29 = vmul.f32 32.0, %v4464_v22  ;;  %vm3010_vm8 = vweird.f32 %v4464_v22 }
 0x97f   : > { %v2923_v62 = vpack.c.bf16 %v2921_v61, %v2921_v61  ;;  %4208 = vmatmul.msk.bf16.vlgmr.msra.gmra.mxu1 %vm2148_vm6, %v2922_v60 }
 0x980   : > { %v3007_v30 = vsub.f32 1.0, %v3006_v29 }
 0x981   : > { %4209 = vmatmul.msk.bf16.vlgmr.msra.gmra.mxu2 %vm2148_vm6, %v2923_v62  ;;  %v4426_v62 = vld [vmem:[%s5314_s13] ss:$0 sm:$0xff] }
 0x982   : > { %v3008_v31 = vmul.f32 %v4464_v22, %v3007_v30 }
 0x9fc   : > { %v2941_v1 = vpop.f32.mrf.mxu1 }
 0xa04   : > { %v2943_v2 = vpop.f32.mrf.mxu1  ;;  %v2960_v5 = vpop.f32.mrf.mxu2 }
 0xa05   : > { %v2964_v6 = vpack.c.bf16 %v2960_v5, %v2941_v1 }
 0xa07   : > { %4211 = vmatmul.msk.bf16.vlgmr.msrb.gmra.mxu3 %vm2148_vm6, %v2964_v6 }
 0xa0c   : > { %v2962_v7 = vpop.f32.mrf.mxu2 }
 0xa0d   : > { %v4360_v7 = vld [vmem:[%s4773_s20 + $0x18] sm:$0xff] }
 0xa0e   : > { %3173 = vmatpush.bf16.msrb.mxu1 %v4360_v7 }
 0xa8a   : > { %v2982_v9 = vpop.f32.mrf.mxu3 }
 0xa8b   : > { %v2987_v10 = vadd.f32 %v2982_v9, %v5104_v32  ;;  %v4358_v9 = vld [vmem:[%s4773_s20 + $0x8] sm:$0xff] }
 0xa8d   : > { %v2993_v11 = vadd.f32 %v4424_v8, %v2987_v10  ;;  %v4357_v10 = vld [vmem:[%s4773_s20] sm:$0xff] }
 0xa8f   : > { %v2995_v12 = vadd.f32 %v2993_v11, %v4969_v42  ;;  %v3009_v42 = vadd.f32 %v4464_v22, %v3008_v31 }
 0xa91   : > { %v2999_v15 = vsel %vm2058_vm5, %v2995_v12, 0.0  ;;  %v5137_v32 = vsel %vm3010_vm8, %v4464_v22, %v3009_v42 }
 0xa92   : > { %3000 = vadd.xlane.f32.xlu1 %v2999_v15  ;;  %v2984_v16 = vpop.f32.mrf.mxu3 }
 0xa93   : > { %v2988_v17 = vadd.f32 %v2984_v16, %v5110_v35 }
 0xa95   : > { %v2994_v18 = vadd.f32 %v4424_v8, %v2988_v17  ;;  %v4359_v8 = vld [vmem:[%s4773_s20 + $0x10] sm:$0xff] }
 0xa96   : > { %3174 = vmatpush.bf16.msrb.mxu1 %v4359_v8 }
 0xa97   : > { %v2996_v19 = vadd.f32 %v2994_v18, %v4971_v43 }
 0xa99   : > { %v3002_v20 = vsel %vm2058_vm5, %v2996_v19, 0.0 }
 0xa9a   : > { %3003 = vadd.xlane.f32.xlu2 %v3002_v20  ;;  %3175 = vmatpush.bf16.msrb.mxu1 %v4358_v9 }
 0xa9e   : > { %3176 = vmatpush.bf16.msrb.mxu1 %v4357_v10 }
 0xb05   : > { %v3001_v33 = vpop.xlane.xlu1 %3000 }
 0xb06   : > { %v3012_v34 = vmul.f32 %v5137_v32, %v3001_v33 }
 0xb08   : > { %v3014_v35 = vsub.f32 %v2995_v12, %v3012_v34  ;;  %v4427_v12 = vld [vmem:[%s1172_s19] ss:$0 sm:$0xff] }
 0xb0a   : > { %v3016_v43 = vmul.f32 %v3014_v35, %v3014_v35 }
 0xb0c   : > { %v3018_v36 = vsel %vm2058_vm5, %v3016_v43, 0.0 }
 0xb0d   : > { %3019 = vadd.xlane.f32.xlu0 %v3018_v36  ;;  %v3004_v37 = vpop.xlane.xlu2 %3003 }
 0xb0e   : > { %v3013_v38 = vmul.f32 %v5137_v32, %v3004_v37 }
 0xb10   : > { %v3015_v13 = vsub.f32 %v2996_v19, %v3013_v38 }
 0xb12   : > { %v3017_v27 = vmul.f32 %v3015_v13, %v3015_v13 }
 0xb14   : > { %v3021_v25 = vsel %vm2058_vm5, %v3017_v27, 0.0 }
 0xb15   : > { %3022 = vadd.xlane.f32.xlu1 %v3021_v25 }
 0xb80   : > { %v3020_v44 = vpop.xlane.xlu0 %3019 }
 0xb81   : > { %v3024_v23 = vmul.f32 %v3020_v44, %v5137_v32 }
 0xb83   : > { %v3026_v14 = vadd.f32 1e-05, %v3024_v23 }
 0xb85   : > { %4465 = vrsqrt.f32 %v3026_v14  ;;  %vm3034_vm10 = vweird.f32 %v3026_v14 }
 0xb88   : > { %v3023_v26 = vpop.xlane.xlu1 %3022 }
 0xb89   : > { %v3025_v41 = vmul.f32 %v3023_v26, %v5137_v32 }
 0xb8b   : > { %v4466_v45 = vpop.eup %4465  ;;  %v3027_v3 = vadd.f32 1e-05, %v3025_v41 }
 0xb8c   : > { %v3029_v46 = vmul.f32 %v4466_v45, %v3026_v14  ;;  %vm3035_vm9 = vweird.f32 %v4466_v45 }
 0xb8d   : > { %4467 = vrsqrt.f32 %v3027_v3  ;;  %vm3036_vm11 = vmor %vm3034_vm10, %vm3035_vm9  ;;  %vm3044_vm13 = vweird.f32 %v3027_v3 }
 0xb8e   : > { %v3030_v47 = vmul.f32 %v4466_v45, %v3029_v46 }
 0xb90   : > { %v3031_v48 = vmul.f32 0.5, %v3030_v47 }
 0xb92   : > { %v3032_v50 = vsub.f32 1.5, %v3031_v48 }
 0xb93   : > { %v4468_v51 = vpop.eup %4467 }
 0xb94   : > { %v3033_v52 = vmul.f32 %v4466_v45, %v3032_v50  ;;  %v3039_v53 = vmul.f32 %v4468_v51, %v3027_v3  ;;  %vm3045_vm12 = vweird.f32 %v4468_v51 }
 0xb95   : > { %vm3046_vm14 = vmor %vm3044_vm13, %vm3045_vm12 }
 0xb96   : > { %v3040_v54 = vmul.f32 %v4468_v51, %v3039_v53  ;;  %v3037_v55 = vsel %vm3036_vm11, %v4466_v45, %v3033_v52  ;;  %v4430_v53 = vld [vmem:[%s1202_s16] ss:$0 sm:$0xff] }
 0xb97   : > { %v3048_v59 = vmul.f32 %v3037_v55, %v3014_v35 }
 0xb98   : > { %v3041_v56 = vmul.f32 0.5, %v3040_v54 }
 0xb99   : > { %v3053_v63 = vmul.f32 %v4425_v58, %v3048_v59 }
 0xb9a   : > { %v3042_v57 = vsub.f32 1.5, %v3041_v56 }
 0xb9b   : > { %v3058_v2 = vadd.f32 %v4426_v62, %v3053_v63 }
 0xb9c   : > { %v3043_v60 = vmul.f32 %v4468_v51, %v3042_v57 }
 0xb9e   : > { %v3047_v61 = vsel %vm3046_vm14, %v4468_v51, %v3043_v60  ;;  %v4429_v51 = vld [vmem:[%s1195_s9] ss:$0 sm:$0xff] }
 0xb9f   : > { %v3049_v0 = vmul.f32 %v3047_v61, %v3015_v13 }
 0xba1   : > { %v3054_v1 = vmul.f32 %v4425_v58, %v3049_v0 }
 0xba3   : > { %v3059_v5 = vadd.f32 %v4426_v62, %v3054_v1 }
 0xba5   : > { %v3060_v6 = vpack.c.bf16 %v3059_v5, %v3058_v2 }
 0xba7   : > { %4220 = vmatmul.msk.bf16.vlgmr.msra.gmra.mxu0 %vm2058_vm5, %v3060_v6 }
 0xc24   : > { %v3093_v11 = vpop.f32.mrf.mxu0 }
 0xc25   : > { %v3094_v15 = vadd.f32 %v4427_v12, %v3093_v11 }
 0xc27   : > { %v3098_v18 = vmax.f32 %v3094_v15, 0.0 }
 0xc2c   : > { %v3095_v16 = vpop.f32.mrf.mxu0 }
 0xc2d   : > { %v3096_v17 = vadd.f32 %v4427_v12, %v3095_v16 }
 0xc2f   : > { %v3099_v19 = vmax.f32 %v3096_v17, 0.0 }
 0xc31   : > { %v3100_v20 = vpack.c.bf16 %v3099_v19, %v3098_v18 }
 0xc33   : > { %3177 = vmatmul.bf16.vlgmr.msrb.gmra.mxu1 %v3100_v20 }
 0xcb0   : > { %v3178_v22 = vpop.f32.mrf.mxu1 }
 0xcb1   : > { %v3179_v29 = vadd.f32 %v4428_v21, %v3178_v22 }
 0xcb3   : > { %v3183_v30 = vadd.f32 %v3179_v29, %v3058_v2 }
 0xcb5   : > { %v3187_v31 = vsel %vm2058_vm5, %v3183_v30, 0.0 }
 0xcb6   : > { %3188 = vadd.xlane.f32.xlu2 %v3187_v31 }
 0xcb8   : > { %v3180_v42 = vpop.f32.mrf.mxu1 }
 0xcb9   : > { %v3181_v33 = vadd.f32 %v4428_v21, %v3180_v42 }
 0xcbb   : > { %v3184_v34 = vadd.f32 %v3181_v33, %v3059_v5 }
 0xcbd   : > { %v3190_v35 = vsel %vm2058_vm5, %v3184_v34, 0.0 }
 0xcbe   : > { %3191 = vadd.xlane.f32.xlu0 %v3190_v35 }
 0xd29   : > { %v3189_v43 = vpop.xlane.xlu2 %3188 }
 0xd2a   : > { %v3193_v36 = vmul.f32 %v3189_v43, %v5137_v32 }
 0xd2c   : > { %v3195_v37 = vsub.f32 %v3183_v30, %v3193_v36 }
 0xd2e   : > { %v3197_v38 = vmul.f32 %v3195_v37, %v3195_v37 }
 0xd30   : > { %v3199_v13 = vsel %vm2058_vm5, %v3197_v38, 0.0 }
 0xd31   : > { %v3192_v27 = vpop.xlane.xlu0 %3191  ;;  %3200 = vadd.xlane.f32.xlu1 %v3199_v13 }
 0xd32   : > { %v3194_v25 = vmul.f32 %v3192_v27, %v5137_v32 }
 0xd34   : > { %v3196_v39 = vsub.f32 %v3184_v34, %v3194_v25 }
 0xd36   : > { %v3198_v44 = vmul.f32 %v3196_v39, %v3196_v39 }
 0xd38   : > { %v3202_v23 = vsel %vm2058_vm5, %v3198_v44, 0.0 }
 0xd39   : > { %3203 = vadd.xlane.f32.xlu2 %v3202_v23 }
 0xda4   : > { %v3201_v40 = vpop.xlane.xlu1 %3200 }
 0xda5   : > { %v3205_v14 = vmul.f32 %v3201_v40, %v5137_v32 }
 0xda7   : > { %v3207_v28 = vadd.f32 1e-05, %v3205_v14 }
 0xda9   : > { %4469 = vrsqrt.f32 %v3207_v28  ;;  %vm3215_vm0 = vweird.f32 %v3207_v28 }
 0xdac   : > { %v3204_v26 = vpop.xlane.xlu2 %3203 }
 0xdad   : > { %v3206_v41 = vmul.f32 %v3204_v26, %v5137_v32 }
 0xdaf   : > { %v4470_v24 = vpop.eup %4469  ;;  %v3208_v45 = vadd.f32 1e-05, %v3206_v41 }
 0xdb0   : > { %v3210_v3 = vmul.f32 %v4470_v24, %v3207_v28  ;;  %vm3216_vm15 = vweird.f32 %v4470_v24 }
 0xdb1   : > { %4471 = vrsqrt.f32 %v3208_v45  ;;  %vm3217_vm1 = vmor %vm3215_vm0, %vm3216_vm15  ;;  %vm3225_vm3 = vweird.f32 %v3208_v45 }
 0xdb2   : > { %v3211_v46 = vmul.f32 %v4470_v24, %v3210_v3 }
 0xdb4   : > { %v3212_v4 = vmul.f32 0.5, %v3211_v46 }
 0xdb6   : > { %v3213_v47 = vsub.f32 1.5, %v3212_v4 }
 0xdb7   : > { %v4472_v48 = vpop.eup %4471 }
 0xdb8   : > { %v3214_v49 = vmul.f32 %v4470_v24, %v3213_v47  ;;  %v3220_v50 = vmul.f32 %v4472_v48, %v3208_v45  ;;  %vm3226_vm2 = vweird.f32 %v4472_v48 }
 0xdb9   : > { %vm3227_vm4 = vmor %vm3225_vm3, %vm3226_vm2 }
 0xdba   : > { %v3218_v32 = vsel %vm3217_vm1, %v4470_v24, %v3214_v49  ;;  %v3221_v52 = vmul.f32 %v4472_v48, %v3220_v50 }
 0xdbb   : > { %v3229_v54 = vmul.f32 %v3218_v32, %v3195_v37 }
 0xdbc   : > { %v3222_v55 = vmul.f32 0.5, %v3221_v52 }
 0xdbd   : > { %v3234_v56 = vmul.f32 %v4429_v51, %v3229_v54 }
 0xdbe   : > { %v3223_v57 = vsub.f32 1.5, %v3222_v55 }
 0xdbf   : > { %v3239_v58 = vadd.f32 %v4430_v53, %v3234_v56 }
 0xdc0   : > { %v3224_v59 = vmul.f32 %v4472_v48, %v3223_v57 }
 0xdc1   : > { %3241 = vst.msk [vmem:[#allocation2] sm:$0xff] %vm2058_vm5, %v3239_v58 }
 0xdc2   : > { %v3228_v60 = vsel %vm3227_vm4, %v4472_v48, %v3224_v59 }
 0xdc3   : > { %v3230_v61 = vmul.f32 %v3228_v60, %v3196_v39 }
 0xdc5   : > { %v3235_v62 = vmul.f32 %v4429_v51, %v3230_v61  ;;  %3246 = sbr.rel (%p4253_p9) target bundleno = 3695 (0xe6f), region = 108 }
 0xdc7   : > { %v3240_v63 = vadd.f32 %v4430_v53, %v3235_v62 }
 0xdc9   : > { %3242 = vst.msk [vmem:[#allocation2 + $0x8] sm:$0xff] %vm2058_vm5, %v3240_v63 }
 0xdca   : > { %v3252_v0 = vlaneseq  ;;  %v3247_v1 = vld [vmem:[#allocation3] sm:$0x3]  ;;  %v4527_v5 = vmov 0.0   ;;  %vm3327_vm14 = vcmask 1041409   ;;  %vm3330_vm15 = vcmask 254976  }
 0xdcb   : > { %vm3248_vm6 = vcmp.eq.f32.partialorder %v3247_v1, 0.0 }
 0xdcc   : > { %v3253_v2 = vshrl.u32 %v3252_v0, 7  ;;  %v4254_v6 = vsel %vm3248_vm6, 1.0, %v4527_v5 }
 0xdcd   : > { %v3251_v7 = vperm.slane %v4254_v6, 0  ;;  %v3258_v8 = vperm.slane %v4254_v6, 1 }
 0xdce   : > { %4473 = vset.pattern.permute.xlu0 %v3253_v2 }
 0xdcf   : > { %v4474_v9 = vpack.i.bf16 %v3258_v8, %v3251_v7 }
 0xdd6   : > { %4475 = vperm.xlu0 %4473, %v4474_v9  }
 0xe48   : > { %v4476_v10 = vpop.permute.xlu0 %4475 }
 0xe49   : > { %v4478_v11 = vunpack.i.h.bf16 %v4476_v10  ;;  %v4477_v12 = vunpack.i.l.bf16 %v4476_v10 }
 0xe4b   : > { %v3287_v15 = vrot.slane %v4478_v11, 4  ;;  %v3281_v16 = vrot.slane %v4477_v12, 4  ;;  %v3266_v17 = vmul.f32 %v4478_v11, %v3240_v63  ;;  %v3265_v20 = vmul.f32 %v4477_v12, %v3239_v58 }
 0xe4d   : > { %v3288_v18 = vadd.f32 %v4478_v11, %v3287_v15  ;;  %v3282_v19 = vadd.f32 %v4477_v12, %v3281_v16  ;;  %v3274_v29 = vsel %vm2058_vm5, %v3266_v17, 0.0  ;;  %v3267_v42 = vsel %vm2058_vm5, %v3265_v20, 0.0 }
 0xe4e   : > { %v3275_v33 = vrot.slane %v3274_v29, 4  ;;  %v3268_v36 = vrot.slane %v3267_v42, 4 }
 0xe4f   : > { %v3289_v21 = vrot.slane %v3288_v18, 2  ;;  %v3283_v22 = vrot.slane %v3282_v19, 2 }
 0xe50   : > { %v3276_v38 = vadd.f32 %v3275_v33, %v3274_v29  ;;  %v3269_v25 = vadd.f32 %v3268_v36, %v3267_v42 }
 0xe51   : > { %v3290_v30 = vadd.f32 %v3289_v21, %v3288_v18  ;;  %v3284_v31 = vadd.f32 %v3283_v22, %v3282_v19 }
 0xe52   : > { %v3277_v39 = vrot.slane %v3276_v38, 2  ;;  %v3270_v44 = vrot.slane %v3269_v25, 2 }
 0xe53   : > { %v3291_v34 = vrot.slane %v3290_v30, 1  ;;  %v3285_v35 = vrot.slane %v3284_v31, 1 }
 0xe54   : > { %v3278_v40 = vadd.f32 %v3277_v39, %v3276_v38  ;;  %v3271_v26 = vadd.f32 %v3270_v44, %v3269_v25 }
 0xe55   : > { %v3292_v43 = vadd.f32 %v3291_v34, %v3290_v30  ;;  %v3286_v37 = vadd.f32 %v3285_v35, %v3284_v31 }
 0xe56   : > { %v3279_v45 = vrot.slane %v3278_v40, 1  ;;  %v3272_v49 = vrot.slane %v3271_v26, 1 }
 0xe57   : > { %v3294_v13 = vmax.f32 %v3292_v43, 1.0  ;;  %v3293_v27 = vmax.f32 %v3286_v37, 1.0 }
 0xe58   : > { %v3280_v54 = vadd.f32 %v3279_v45, %v3278_v40  ;;  %v3273_v58 = vadd.f32 %v3272_v49, %v3271_v26 }
 0xe59   : > { %4479 = vrcp.f32 %v3294_v13  ;;  %v3321_v3 = vand.u32 2147483648, %v3294_v13  ;;  %v3319_v47 = vand.u32 2147483647, %v3294_v13  ;;  %v3306_v48 = vand.u32 2147483648, %v3293_v27 }
 0xe5a   : > { %4481 = vrcp.f32 %v3293_v27  ;;  %v3304_v51 = vand.u32 2147483647, %v3293_v27  ;;  %vm3315_vm8 = vweird.f32 %v3294_v13  ;;  %vm3300_vm10 = vweird.f32 %v3293_v27 }
 0xe5b   : > { %v3322_v52 = vor.u32 1.1754944e-38, %v3321_v3  ;;  %vm3320_vm11 = vcmp.eq.f32.partialorder %v3319_v47, 8.507059e+37  ;;  %v3307_v56 = vor.u32 1.1754944e-38, %v3306_v48 }
 0xe5c   : > { %vm3305_vm13 = vcmp.eq.f32.partialorder %v3304_v51, 8.507059e+37 }
 0xe5f   : > { %v4480_v23 = vpop.eup %4479 }
 0xe60   : > { %v4482_v14 = vpop.eup %4481  ;;  %v3311_v28 = vmul.f32 %v4480_v23, %v3294_v13  ;;  %vm3316_vm5 = vweird.f32 %v4480_v23 }
 0xe61   : > { %v3296_v41 = vmul.f32 %v4482_v14, %v3293_v27  ;;  %vm3301_vm7 = vweird.f32 %v4482_v14  ;;  %vm3317_vm9 = vmor %vm3315_vm8, %vm3316_vm5 }
 0xe62   : > { %v3312_v24 = vsub.f32 1.0, %v3311_v28  ;;  %vm3302_vm12 = vmor %vm3300_vm10, %vm3301_vm7 }
 0xe63   : > { %v3297_v46 = vsub.f32 1.0, %v3296_v41 }
 0xe64   : > { %v3313_v4 = vmul.f32 %v4480_v23, %v3312_v24 }
 0xe65   : > { %v3298_v50 = vmul.f32 %v4482_v14, %v3297_v46 }
 0xe66   : > { %v3314_v32 = vadd.f32 %v4480_v23, %v3313_v4 }
 0xe67   : > { %v3299_v53 = vadd.f32 %v4482_v14, %v3298_v50 }
 0xe68   : > { %v3318_v55 = vsel %vm3317_vm9, %v4480_v23, %v3314_v32 }
 0xe69   : > { %v3323_v57 = vsel %vm3320_vm11, %v3322_v52, %v3318_v55  ;;  %v3303_v59 = vsel %vm3302_vm12, %v4482_v14, %v3299_v53 }
 0xe6a   : > { %v3324_v60 = vmul.f32 %v3323_v57, %v3280_v54  ;;  %v3308_v61 = vsel %vm3305_vm13, %v3307_v56, %v3303_v59 }
 0xe6b   : > { %v3309_v62 = vmul.f32 %v3308_v61, %v3273_v58 }
 0xe6d   : > { %v3328_v63 = vsel %vm3327_vm14, %v3324_v60, %v3309_v62 }
 0xe6e   : > { %3331 = vst.msk [vmem:[%s5319_s1] sm:$0x3] %vm3330_vm15, %v3328_v63 }
 0xe6f PF: > { %s5320_s0 = sld [smem:[#allocation6_spill]] }
 0xe70   : > { %s5321_s1 = sld [smem:[#allocation4_spill]] }
 0xe71   : > { %s5322_s22 = sld [smem:[#allocation5_spill]] }
 0xe72   : > { %s5323_s23 = sld [smem:[#allocation7_spill]] }
 0xe73   : > { %s5324_s24 = sld [smem:[#allocation8_spill]] }
 0xe75   : > { %s30_s2 = sadd.s32 1, %s5320_s0  }
 0xe76   : > { %p27_p10 = scmp.ge.s32.totalorder %s30_s2, 6  }
 0xe78   :  { %29 = sbr.rel (!%p27_p10) target bundleno = 21 (0x15), region = 216 }

</bundles_post_ra>
